<compile_context>
chip_gen: v7x
topology: tpu7x:2x2x1
jax: 0.10.0
libtpu: 0.0.40
codegen_flags: <defaults>
</compile_context>

<pallas_src>
import functools

import jax
import jax.numpy as jnp
from jax.experimental import pallas as pl
from jax.experimental.pallas import tpu as pltpu

_LANE = 128


def _round_up(x, m):
    return ((x + m - 1) // m) * m


def _leaky_relu(y, alpha):
    return jnp.where(y >= 0, y, alpha * y)


# ----------------------------------------------------------------------------
# Single fused kernel: all MP steps + (out_proj folded into 'global mix')
# ----------------------------------------------------------------------------
def _encoder_kernel(x_ref, mats_ref, rows_ref, mixw_ref, o_ref, *,
                    steps, alphas, num_nodes, width, mix_b_row, compute_dtype):
    N = num_nodes
    Wp = width

    x = x_ref[0].astype(jnp.float32)                      # (N, Wp); pad cols = 0

    for meta, alpha in zip(steps, alphas):
        xc = x.astype(compute_dtype)

        # Pairwise euclidean distances from differences (accurate; padded
        # feature columns are zero so they do not perturb the distance).
        diff = x[:, None, :] - x[None, :, :]               # (N, N, Wp)
        dist = jnp.sqrt(jnp.sum(diff * diff, axis=-1))     # (N, N)

        # First edge layer via P/Q split -- [x_i, x_j, dist] never materialized:
        #   h[i, j] = x_i @ Wxi + x_j @ Wxj + dist[i, j] * w_d + b0
        P = jnp.dot(xc, mats_ref[meta["e_Wxi"]].astype(compute_dtype),
                    preferred_element_type=jnp.float32)    # (N, Wp)
        Q = jnp.dot(xc, mats_ref[meta["e_Wxj"]].astype(compute_dtype),
                    preferred_element_type=jnp.float32)    # (N, Wp)
        wd = rows_ref[meta["e_wd"]]                        # (Wp,)
        b0 = rows_ref[meta["e_b0"]]                        # (Wp,)
        h = (P[:, None, :] + Q[None, :, :]
             + dist[:, :, None] * wd[None, None, :]
             + b0[None, None, :])                          # (N, N, Wp)
        h = _leaky_relu(h, alpha).reshape(N * N, Wp)

        # Remaining edge layers on the (N*N, Wp) slab (stays in VMEM).
        for (wi, bi) in meta["e_rest"]:
            y = jnp.dot(h.astype(compute_dtype),
                        mats_ref[wi].astype(compute_dtype),
                        preferred_element_type=jnp.float32) + rows_ref[bi][None, :]
            h = _leaky_relu(y, alpha)

        # Sum-aggregate over the neighbor axis j (in VMEM).
        agg = jnp.sum(h.reshape(N, N, Wp), axis=1)         # (N, Wp)

        # Node MLP; first layer split so [x, agg] is never concatenated.
        y = (jnp.dot(xc, mats_ref[meta["n_Wx"]].astype(compute_dtype),
                     preferred_element_type=jnp.float32)
             + jnp.dot(agg.astype(compute_dtype),
                       mats_ref[meta["n_Wagg"]].astype(compute_dtype),
                       preferred_element_type=jnp.float32)
             + rows_ref[meta["n_b0"]][None, :])
        h = _leaky_relu(y, alpha)
        for (wi, bi) in meta["n_rest"]:
            y = jnp.dot(h.astype(compute_dtype),
                        mats_ref[wi].astype(compute_dtype),
                        preferred_element_type=jnp.float32) + rows_ref[bi][None, :]
            h = _leaky_relu(y, alpha)
        x = h                                              # (N, Wp), pad cols = 0

    # Epilogue: fused out_proj + bias-free 'global mix', algebraically folded
    # into a single matmul on the parameters: z = flatten(x) @ W_big + b_eff.
    z = (jnp.dot(x.reshape(1, N * Wp).astype(compute_dtype),
                 mixw_ref[...].astype(compute_dtype),
                 preferred_element_type=jnp.float32)
         + rows_ref[mix_b_row][None, :])                   # (1, Wp)
    o_ref[0] = z.astype(o_ref.dtype)


# ----------------------------------------------------------------------------
# Forward wrapper (one pallas_call for the whole encoder)
# ----------------------------------------------------------------------------
def encoder_forward(arrays, x, *, meta, alphas, compute_dtype=jnp.float32,
                    metric="euclidean"):
    """x: (B, N, input_node_size) -> (B, latent_node_size)."""
    assert metric == "euclidean"
    B, N, F_in = x.shape
    Wp = meta["width"]
    L = meta["latent_node_size"]
    assert N == meta["num_nodes"]
    if F_in < Wp:                                          # pad features once
        x = jnp.pad(x, ((0, 0), (0, 0), (0, Wp - F_in)))

    mats = arrays["mats"]
    rows = arrays["rows"]
    mixw = arrays["mix_W"]

    kernel = functools.partial(
        _encoder_kernel,
        steps=meta["steps"],
        alphas=tuple(float(a) for a in alphas),
        num_nodes=N,
        width=Wp,
        mix_b_row=meta["mix_b_row"],
        compute_dtype=compute_dtype,
    )

    out = pl.pallas_call(
        kernel,
        out_shape=jax.ShapeDtypeStruct((B, 1, Wp), x.dtype),
        grid_spec=pltpu.PrefetchScalarGridSpec(
            num_scalar_prefetch=0,
            grid=(B,),
            in_specs=[
                # lane-dense node features: (1, N, 128) block per batch element
                pl.BlockSpec((1, N, Wp), lambda b: (b, 0, 0)),
                # packed weight stacks: full-extent, constant-index, VMEM-resident
                pl.BlockSpec(mats.shape, lambda b: (0, 0, 0)),
                pl.BlockSpec(rows.shape, lambda b: (0, 0)),
                pl.BlockSpec(mixw.shape, lambda b: (0, 0)),
            ],
            out_specs=pl.BlockSpec((1, 1, Wp), lambda b: (b, 0, 0)),
        ),
        compiler_params=pltpu.CompilerParams(
            dimension_semantics=("parallel",)),
    )(x, mats, rows, mixw)

    return out.reshape(B, Wp)[:, :L]                       # (B, latent)


# ----------------------------------------------------------------------------
# Parameter init (PyTorch nn.Linear layout, (fan_in, fan_out))
# ----------------------------------------------------------------------------
def _init_linear(key, fan_in, fan_out, dtype, bias=True):
    kw, kb = jax.random.split(key)
    scale = 1.0 / jnp.sqrt(jnp.asarray(fan_in, dtype))
    W = jax.random.uniform(kw, (fan_in, fan_out), dtype, -scale, scale)
    b = jax.random.uniform(kb, (fan_out,), dtype, -scale, scale) if bias else None
    return W, b


def init_encoder_params(key, *, num_nodes, input_node_size, latent_node_size,
                        node_sizes, edge_sizes, num_mps, dtype=jnp.float32):
    assert input_node_size <= node_sizes[0][0]
    params = {"pad_dim": node_sizes[0][0], "edge_nets": [], "node_nets": []}
    d = node_sizes[0][0]
    for i in range(num_mps):
        in_dim = 2 * d + 1                                 # [x_i, x_j, dist]
        layers = []
        for out_dim in edge_sizes[i]:
            key, sub = jax.random.split(key)
            layers.append(_init_linear(sub, in_dim, out_dim, dtype))
            in_dim = out_dim
        params["edge_nets"].append(layers)
        e_out = edge_sizes[i][-1]
        in_dim = d + e_out                                 # [x, aggregated_edges]
        layers = []
        for out_dim in node_sizes[i]:
            key, sub = jax.random.split(key)
            layers.append(_init_linear(sub, in_dim, out_dim, dtype))
            in_dim = out_dim
        params["node_nets"].append(layers)
        d = node_sizes[i][-1]
    # final per-node projection to latent_node_size ('global mix' out size)
    key, sub = jax.random.split(key)
    params["out_proj"] = _init_linear(sub, d, latent_node_size, dtype)
    # 'global mix' layer: Linear(latent*num_nodes -> latent), bias=False
    key, sub = jax.random.split(key)
    params["mix_W"], _ = _init_linear(
        sub, latent_node_size * num_nodes, latent_node_size, dtype, bias=False)
    return params


def prepare_params(raw, *, num_nodes, latent_node_size):
    """Pad every width to a common 128-multiple, split the first edge/node
    layers (xi/xj/dist and x/agg), stack all weights into one (n_mats, W, W)
    array + one (n_rows, W) array, and fold out_proj into the mix layer.
    Returns (arrays, meta): arrays = jnp arrays only, meta = Python data only
    (so meta can be captured statically and never becomes a tracer)."""
    d0 = raw["pad_dim"]
    widths = [d0, latent_node_size]
    for e_layers, n_layers in zip(raw["edge_nets"], raw["node_nets"]):
        widths += [W.shape[1] for (W, _) in e_layers]
        widths += [W.shape[1] for (W, _) in n_layers]
    Wp = _round_up(max(widths), _LANE)

    mats, rows = [], []

    def add_mat(W):
        a, b = W.shape
        mats.append(jnp.pad(W, ((0, Wp - a), (0, Wp - b))))
        return len(mats) - 1

    def add_row(v):
        v = jnp.asarray(v).reshape(-1)
        rows.append(jnp.pad(v, (0, Wp - v.shape[0])))
        return len(rows) - 1

    steps = []
    d = d0
    for e_layers, n_layers in zip(raw["edge_nets"], raw["node_nets"]):
        W0, b0 = e_layers[0]                               # (2d+1, E0), (E0,)
        e_last = e_layers[-1][0].shape[1]
        Wn0, bn0 = n_layers[0]                             # (d+E_last, H0), (H0,)
        step = {
            "e_Wxi": add_mat(W0[:d]),
            "e_Wxj": add_mat(W0[d:2 * d]),
            "e_wd": add_row(W0[2 * d]),
            "e_b0": add_row(b0),
            "e_rest": tuple((add_mat(W), add_row(b)) for (W, b) in e_layers[1:]),
            "n_Wx": add_mat(Wn0[:d]),
            "n_Wagg": add_mat(Wn0[d:d + e_last]),
            "n_b0": add_row(bn0),
            "n_rest": tuple((add_mat(W), add_row(b)) for (W, b) in n_layers[1:]),
        }
        steps.append(step)
        d = n_layers[-1][0].shape[1]

    # Fold out_proj (d -> L, with bias) into the bias-free mix (N*L -> L):
    #   z_b = sum_n (x_{b,n} @ W_out + b_out) @ W_mix[n*L:(n+1)*L]
    #       = flatten(x_b) @ W_big + b_eff
    W_out, b_out = raw["out_proj"]                         # (d, L), (L,)
    L = latent_node_size
    Wm3 = raw["mix_W"].reshape(num_nodes, L, L)
    W_big = jnp.einsum("dl,nlm->ndm", W_out, Wm3)          # (N, d, L)
    W_big = jnp.pad(W_big, ((0, 0), (0, Wp - d), (0, Wp - L)))
    W_big = W_big.reshape(num_nodes * Wp, Wp)
    b_eff = jnp.einsum("l,nlm->m", b_out, Wm3)             # (L,)
    mix_b_row = add_row(b_eff)

    arrays = {"mats": jnp.stack(mats), "rows": jnp.stack(rows), "mix_W": W_big}
    meta = {"width": Wp, "num_nodes": num_nodes, "latent_node_size": L,
            "pad_dim": d0, "steps": tuple(steps), "mix_b_row": mix_b_row}
    return arrays, meta


# ----------------------------------------------------------------------------
if __name__ == "__main__":
    batch = 2
    num_nodes = 8
    input_node_size = 4
    latent_node_size = 8
    num_mps = 2
    node_sizes = [[16, 16], [16, 16]]
    edge_sizes = [[16, 16], [16, 16]]
    alphas = [0.1, 0.1]
    dtype = jnp.float32

    key = jax.random.PRNGKey(0)
    k_in, k_par = jax.random.split(key)
    x = jax.random.normal(k_in, (batch, num_nodes, input_node_size), dtype)

    raw_params = init_encoder_params(
        k_par,
        num_nodes=num_nodes,
        input_node_size=input_node_size,
        latent_node_size=latent_node_size,
        node_sizes=node_sizes,
        edge_sizes=edge_sizes,
        num_mps=num_mps,
        dtype=dtype,
    )
    arrays, meta = prepare_params(raw_params, num_nodes=num_nodes,
                                  latent_node_size=latent_node_size)

    # compute_dtype=jnp.bfloat16 feeds MXU-native operands on v6e/v7x (f32
    # accumulation, f32 elementwise path kept for v5e); f32 default here to
    # stay close to the float64 PyTorch reference.
    fwd = jax.jit(functools.partial(encoder_forward, meta=meta,
                                    alphas=tuple(alphas),
                                    compute_dtype=jnp.float32))
    out = fwd(arrays, x)
    out = jax.block_until_ready(out)
    assert out.shape == (batch, latent_node_size), out.shape
    assert bool(jnp.all(jnp.isfinite(out)))
    print("KERNEL_OK")
</pallas_src>

<mosaic_0001>
module attributes {stable_mosaic.version = 11 : i64} {
  func.func @_encoder_kernel(%arg0: i32, %arg1: memref<1x8x128xf32, #tpu.memory_space<vmem>>, %arg2: memref<12x128x128xf32, #tpu.memory_space<vmem>>, %arg3: memref<11x128xf32, #tpu.memory_space<vmem>>, %arg4: memref<1024x128xf32, #tpu.memory_space<vmem>>, %arg5: memref<1x1x128xf32, #tpu.memory_space<vmem>>) attributes {dimension_semantics = [#tpu.dimension_semantics<parallel>], iteration_bounds = array<i64: 2>, scalar_prefetch = 0 : i64, scratch_operands = 0 : i64, tpu.core_type = #tpu.core_type<tc>, window_params = [{transform_indices = @transform_0, window_bounds = array<i64: 1, 8, 128>}, {pipeline_mode = #tpu.pipeline_mode<synchronous>, transform_indices = @transform_1, window_bounds = array<i64: 12, 128, 128>}, {pipeline_mode = #tpu.pipeline_mode<synchronous>, transform_indices = @transform_2, window_bounds = array<i64: 11, 128>}, {pipeline_mode = #tpu.pipeline_mode<synchronous>, transform_indices = @transform_3, window_bounds = array<i64: 1024, 128>}, {transform_indices = @transform_4, window_bounds = array<i64: 1, 1, 128>}]} {
    %c0 = arith.constant 0 : index
    %c0_0 = arith.constant 0 : index
    %c0_1 = arith.constant 0 : index
    %0 = vector.load %arg1[%c0, %c0_0, %c0_1] : memref<1x8x128xf32, #tpu.memory_space<vmem>>, vector<1x8x128xf32>
    %1 = vector.shape_cast %0 : vector<1x8x128xf32> to vector<8x128xf32>
    %2 = vector.shape_cast %1 : vector<8x128xf32> to vector<8x1x128xf32>
    %3 = vector.shape_cast %1 : vector<8x128xf32> to vector<1x8x128xf32>
    %4 = vector.broadcast %2 : vector<8x1x128xf32> to vector<8x8x128xf32>
    %5 = vector.broadcast %3 : vector<1x8x128xf32> to vector<8x8x128xf32>
    %6 = arith.subf %4, %5 : vector<8x8x128xf32>
    %7 = arith.mulf %6, %6 : vector<8x8x128xf32>
    %cst = arith.constant dense<0.000000e+00> : vector<8x8xf32>
    %8 = vector.multi_reduction <add>, %7, %cst [2] : vector<8x8x128xf32> to vector<8x8xf32>
    %9 = math.sqrt %8 : vector<8x8xf32>
    %c0_2 = arith.constant 0 : index
    %c0_3 = arith.constant 0 : index
    %c0_4 = arith.constant 0 : index
    %10 = vector.load %arg2[%c0_2, %c0_3, %c0_4] : memref<12x128x128xf32, #tpu.memory_space<vmem>>, vector<1x128x128xf32>
    %11 = vector.shape_cast %10 : vector<1x128x128xf32> to vector<128x128xf32>
    %cst_5 = arith.constant dense<0.000000e+00> : vector<8x128xf32>
    %12 = tpu.matmul %1, %11, %cst_5 {dimension_numbers = #tpu.dot_dimension_numbers<[1], [0], [0], [1], [0, 0, 1, 1], [], []>} : vector<8x128xf32>, vector<128x128xf32>, vector<8x128xf32> -> vector<8x128xf32>
    %c1 = arith.constant 1 : index
    %c0_6 = arith.constant 0 : index
    %c0_7 = arith.constant 0 : index
    %13 = vector.load %arg2[%c1, %c0_6, %c0_7] : memref<12x128x128xf32, #tpu.memory_space<vmem>>, vector<1x128x128xf32>
    %14 = vector.shape_cast %13 : vector<1x128x128xf32> to vector<128x128xf32>
    %cst_8 = arith.constant dense<0.000000e+00> : vector<8x128xf32>
    %15 = tpu.matmul %1, %14, %cst_8 {dimension_numbers = #tpu.dot_dimension_numbers<[1], [0], [0], [1], [0, 0, 1, 1], [], []>} : vector<8x128xf32>, vector<128x128xf32>, vector<8x128xf32> -> vector<8x128xf32>
    %c0_9 = arith.constant 0 : index
    %c0_10 = arith.constant 0 : index
    %16 = vector.load %arg3[%c0_9, %c0_10] : memref<11x128xf32, #tpu.memory_space<vmem>>, vector<1x128xf32>
    %17 = vector.shape_cast %16 : vector<1x128xf32> to vector<128xf32>
    %c1_11 = arith.constant 1 : index
    %c0_12 = arith.constant 0 : index
    %18 = vector.load %arg3[%c1_11, %c0_12] : memref<11x128xf32, #tpu.memory_space<vmem>>, vector<1x128xf32>
    %19 = vector.shape_cast %18 : vector<1x128xf32> to vector<128xf32>
    %20 = vector.shape_cast %12 : vector<8x128xf32> to vector<8x1x128xf32>
    %21 = vector.shape_cast %15 : vector<8x128xf32> to vector<1x8x128xf32>
    %22 = vector.broadcast %20 : vector<8x1x128xf32> to vector<8x8x128xf32>
    %23 = vector.broadcast %21 : vector<1x8x128xf32> to vector<8x8x128xf32>
    %24 = arith.addf %22, %23 : vector<8x8x128xf32>
    %25 = vector.shape_cast %9 : vector<8x8xf32> to vector<8x8x1xf32>
    %26 = vector.shape_cast %17 : vector<128xf32> to vector<1x1x128xf32>
    %27 = vector.broadcast %25 : vector<8x8x1xf32> to vector<8x8x128xf32>
    %28 = vector.broadcast %26 : vector<1x1x128xf32> to vector<8x8x128xf32>
    %29 = arith.mulf %27, %28 : vector<8x8x128xf32>
    %30 = arith.addf %24, %29 : vector<8x8x128xf32>
    %31 = vector.shape_cast %19 : vector<128xf32> to vector<1x1x128xf32>
    %32 = vector.broadcast %31 : vector<1x1x128xf32> to vector<8x8x128xf32>
    %33 = arith.addf %30, %32 : vector<8x8x128xf32>
    %cst_13 = arith.constant 0.000000e+00 : f32
    %34 = vector.broadcast %cst_13 : f32 to vector<8x8x128xf32>
    %35 = arith.cmpf oge, %33, %34 : vector<8x8x128xf32>
    %cst_14 = arith.constant 1.000000e-01 : f32
    %36 = vector.broadcast %cst_14 : f32 to vector<8x8x128xf32>
    %37 = arith.mulf %36, %33 : vector<8x8x128xf32>
    %38 = arith.select %35, %33, %37 : vector<8x8x128xi1>, vector<8x8x128xf32>
    %39 = vector.shape_cast %38 : vector<8x8x128xf32> to vector<64x128xf32>
    %c2 = arith.constant 2 : index
    %c0_15 = arith.constant 0 : index
    %c0_16 = arith.constant 0 : index
    %40 = vector.load %arg2[%c2, %c0_15, %c0_16] : memref<12x128x128xf32, #tpu.memory_space<vmem>>, vector<1x128x128xf32>
    %41 = vector.shape_cast %40 : vector<1x128x128xf32> to vector<128x128xf32>
    %cst_17 = arith.constant dense<0.000000e+00> : vector<64x128xf32>
    %42 = tpu.matmul %39, %41, %cst_17 {dimension_numbers = #tpu.dot_dimension_numbers<[1], [0], [0], [1], [0, 0, 1, 1], [], []>} : vector<64x128xf32>, vector<128x128xf32>, vector<64x128xf32> -> vector<64x128xf32>
    %c2_18 = arith.constant 2 : index
    %c0_19 = arith.constant 0 : index
    %43 = vector.load %arg3[%c2_18, %c0_19] : memref<11x128xf32, #tpu.memory_space<vmem>>, vector<1x128xf32>
    %44 = vector.shape_cast %43 : vector<1x128xf32> to vector<128xf32>
    %45 = vector.shape_cast %44 : vector<128xf32> to vector<1x128xf32>
    %46 = vector.broadcast %45 : vector<1x128xf32> to vector<64x128xf32>
    %47 = arith.addf %42, %46 : vector<64x128xf32>
    %cst_20 = arith.constant 0.000000e+00 : f32
    %48 = vector.broadcast %cst_20 : f32 to vector<64x128xf32>
    %49 = arith.cmpf oge, %47, %48 : vector<64x128xf32>
    %cst_21 = arith.constant 1.000000e-01 : f32
    %50 = vector.broadcast %cst_21 : f32 to vector<64x128xf32>
    %51 = arith.mulf %50, %47 : vector<64x128xf32>
    %52 = arith.select %49, %47, %51 : vector<64x128xi1>, vector<64x128xf32>
    %53 = vector.shape_cast %52 : vector<64x128xf32> to vector<8x8x128xf32>
    %cst_22 = arith.constant dense<0.000000e+00> : vector<8x128xf32>
    %54 = vector.multi_reduction <add>, %53, %cst_22 [1] : vector<8x8x128xf32> to vector<8x128xf32>
    %c3 = arith.constant 3 : index
    %c0_23 = arith.constant 0 : index
    %c0_24 = arith.constant 0 : index
    %55 = vector.load %arg2[%c3, %c0_23, %c0_24] : memref<12x128x128xf32, #tpu.memory_space<vmem>>, vector<1x128x128xf32>
    %56 = vector.shape_cast %55 : vector<1x128x128xf32> to vector<128x128xf32>
    %cst_25 = arith.constant dense<0.000000e+00> : vector<8x128xf32>
    %57 = tpu.matmul %1, %56, %cst_25 {dimension_numbers = #tpu.dot_dimension_numbers<[1], [0], [0], [1], [0, 0, 1, 1], [], []>} : vector<8x128xf32>, vector<128x128xf32>, vector<8x128xf32> -> vector<8x128xf32>
    %c4 = arith.constant 4 : index
    %c0_26 = arith.constant 0 : index
    %c0_27 = arith.constant 0 : index
    %58 = vector.load %arg2[%c4, %c0_26, %c0_27] : memref<12x128x128xf32, #tpu.memory_space<vmem>>, vector<1x128x128xf32>
    %59 = vector.shape_cast %58 : vector<1x128x128xf32> to vector<128x128xf32>
    %cst_28 = arith.constant dense<0.000000e+00> : vector<8x128xf32>
    %60 = tpu.matmul %54, %59, %cst_28 {dimension_numbers = #tpu.dot_dimension_numbers<[1], [0], [0], [1], [0, 0, 1, 1], [], []>} : vector<8x128xf32>, vector<128x128xf32>, vector<8x128xf32> -> vector<8x128xf32>
    %61 = arith.addf %57, %60 : vector<8x128xf32>
    %c3_29 = arith.constant 3 : index
    %c0_30 = arith.constant 0 : index
    %62 = vector.load %arg3[%c3_29, %c0_30] : memref<11x128xf32, #tpu.memory_space<vmem>>, vector<1x128xf32>
    %63 = vector.shape_cast %62 : vector<1x128xf32> to vector<128xf32>
    %64 = vector.shape_cast %63 : vector<128xf32> to vector<1x128xf32>
    %65 = vector.broadcast %64 : vector<1x128xf32> to vector<8x128xf32>
    %66 = arith.addf %61, %65 : vector<8x128xf32>
    %cst_31 = arith.constant 0.000000e+00 : f32
    %67 = vector.broadcast %cst_31 : f32 to vector<8x128xf32>
    %68 = arith.cmpf oge, %66, %67 : vector<8x128xf32>
    %cst_32 = arith.constant 1.000000e-01 : f32
    %69 = vector.broadcast %cst_32 : f32 to vector<8x128xf32>
    %70 = arith.mulf %69, %66 : vector<8x128xf32>
    %71 = arith.select %68, %66, %70 : vector<8x128xi1>, vector<8x128xf32>
    %c5 = arith.constant 5 : index
    %c0_33 = arith.constant 0 : index
    %c0_34 = arith.constant 0 : index
    %72 = vector.load %arg2[%c5, %c0_33, %c0_34] : memref<12x128x128xf32, #tpu.memory_space<vmem>>, vector<1x128x128xf32>
    %73 = vector.shape_cast %72 : vector<1x128x128xf32> to vector<128x128xf32>
    %cst_35 = arith.constant dense<0.000000e+00> : vector<8x128xf32>
    %74 = tpu.matmul %71, %73, %cst_35 {dimension_numbers = #tpu.dot_dimension_numbers<[1], [0], [0], [1], [0, 0, 1, 1], [], []>} : vector<8x128xf32>, vector<128x128xf32>, vector<8x128xf32> -> vector<8x128xf32>
    %c4_36 = arith.constant 4 : index
    %c0_37 = arith.constant 0 : index
    %75 = vector.load %arg3[%c4_36, %c0_37] : memref<11x128xf32, #tpu.memory_space<vmem>>, vector<1x128xf32>
    %76 = vector.shape_cast %75 : vector<1x128xf32> to vector<128xf32>
    %77 = vector.shape_cast %76 : vector<128xf32> to vector<1x128xf32>
    %78 = vector.broadcast %77 : vector<1x128xf32> to vector<8x128xf32>
    %79 = arith.addf %74, %78 : vector<8x128xf32>
    %cst_38 = arith.constant 0.000000e+00 : f32
    %80 = vector.broadcast %cst_38 : f32 to vector<8x128xf32>
    %81 = arith.cmpf oge, %79, %80 : vector<8x128xf32>
    %cst_39 = arith.constant 1.000000e-01 : f32
    %82 = vector.broadcast %cst_39 : f32 to vector<8x128xf32>
    %83 = arith.mulf %82, %79 : vector<8x128xf32>
    %84 = arith.select %81, %79, %83 : vector<8x128xi1>, vector<8x128xf32>
    %85 = vector.shape_cast %84 : vector<8x128xf32> to vector<8x1x128xf32>
    %86 = vector.shape_cast %84 : vector<8x128xf32> to vector<1x8x128xf32>
    %87 = vector.broadcast %85 : vector<8x1x128xf32> to vector<8x8x128xf32>
    %88 = vector.broadcast %86 : vector<1x8x128xf32> to vector<8x8x128xf32>
    %89 = arith.subf %87, %88 : vector<8x8x128xf32>
    %90 = arith.mulf %89, %89 : vector<8x8x128xf32>
    %cst_40 = arith.constant dense<0.000000e+00> : vector<8x8xf32>
    %91 = vector.multi_reduction <add>, %90, %cst_40 [2] : vector<8x8x128xf32> to vector<8x8xf32>
    %92 = math.sqrt %91 : vector<8x8xf32>
    %c6 = arith.constant 6 : index
    %c0_41 = arith.constant 0 : index
    %c0_42 = arith.constant 0 : index
    %93 = vector.load %arg2[%c6, %c0_41, %c0_42] : memref<12x128x128xf32, #tpu.memory_space<vmem>>, vector<1x128x128xf32>
    %94 = vector.shape_cast %93 : vector<1x128x128xf32> to vector<128x128xf32>
    %cst_43 = arith.constant dense<0.000000e+00> : vector<8x128xf32>
    %95 = tpu.matmul %84, %94, %cst_43 {dimension_numbers = #tpu.dot_dimension_numbers<[1], [0], [0], [1], [0, 0, 1, 1], [], []>} : vector<8x128xf32>, vector<128x128xf32>, vector<8x128xf32> -> vector<8x128xf32>
    %c7 = arith.constant 7 : index
    %c0_44 = arith.constant 0 : index
    %c0_45 = arith.constant 0 : index
    %96 = vector.load %arg2[%c7, %c0_44, %c0_45] : memref<12x128x128xf32, #tpu.memory_space<vmem>>, vector<1x128x128xf32>
    %97 = vector.shape_cast %96 : vector<1x128x128xf32> to vector<128x128xf32>
    %cst_46 = arith.constant dense<0.000000e+00> : vector<8x128xf32>
    %98 = tpu.matmul %84, %97, %cst_46 {dimension_numbers = #tpu.dot_dimension_numbers<[1], [0], [0], [1], [0, 0, 1, 1], [], []>} : vector<8x128xf32>, vector<128x128xf32>, vector<8x128xf32> -> vector<8x128xf32>
    %c5_47 = arith.constant 5 : index
    %c0_48 = arith.constant 0 : index
    %99 = vector.load %arg3[%c5_47, %c0_48] : memref<11x128xf32, #tpu.memory_space<vmem>>, vector<1x128xf32>
    %100 = vector.shape_cast %99 : vector<1x128xf32> to vector<128xf32>
    %c6_49 = arith.constant 6 : index
    %c0_50 = arith.constant 0 : index
    %101 = vector.load %arg3[%c6_49, %c0_50] : memref<11x128xf32, #tpu.memory_space<vmem>>, vector<1x128xf32>
    %102 = vector.shape_cast %101 : vector<1x128xf32> to vector<128xf32>
    %103 = vector.shape_cast %95 : vector<8x128xf32> to vector<8x1x128xf32>
    %104 = vector.shape_cast %98 : vector<8x128xf32> to vector<1x8x128xf32>
    %105 = vector.broadcast %103 : vector<8x1x128xf32> to vector<8x8x128xf32>
    %106 = vector.broadcast %104 : vector<1x8x128xf32> to vector<8x8x128xf32>
    %107 = arith.addf %105, %106 : vector<8x8x128xf32>
    %108 = vector.shape_cast %92 : vector<8x8xf32> to vector<8x8x1xf32>
    %109 = vector.shape_cast %100 : vector<128xf32> to vector<1x1x128xf32>
    %110 = vector.broadcast %108 : vector<8x8x1xf32> to vector<8x8x128xf32>
    %111 = vector.broadcast %109 : vector<1x1x128xf32> to vector<8x8x128xf32>
    %112 = arith.mulf %110, %111 : vector<8x8x128xf32>
    %113 = arith.addf %107, %112 : vector<8x8x128xf32>
    %114 = vector.shape_cast %102 : vector<128xf32> to vector<1x1x128xf32>
    %115 = vector.broadcast %114 : vector<1x1x128xf32> to vector<8x8x128xf32>
    %116 = arith.addf %113, %115 : vector<8x8x128xf32>
    %cst_51 = arith.constant 0.000000e+00 : f32
    %117 = vector.broadcast %cst_51 : f32 to vector<8x8x128xf32>
    %118 = arith.cmpf oge, %116, %117 : vector<8x8x128xf32>
    %cst_52 = arith.constant 1.000000e-01 : f32
    %119 = vector.broadcast %cst_52 : f32 to vector<8x8x128xf32>
    %120 = arith.mulf %119, %116 : vector<8x8x128xf32>
    %121 = arith.select %118, %116, %120 : vector<8x8x128xi1>, vector<8x8x128xf32>
    %122 = vector.shape_cast %121 : vector<8x8x128xf32> to vector<64x128xf32>
    %c8 = arith.constant 8 : index
    %c0_53 = arith.constant 0 : index
    %c0_54 = arith.constant 0 : index
    %123 = vector.load %arg2[%c8, %c0_53, %c0_54] : memref<12x128x128xf32, #tpu.memory_space<vmem>>, vector<1x128x128xf32>
    %124 = vector.shape_cast %123 : vector<1x128x128xf32> to vector<128x128xf32>
    %cst_55 = arith.constant dense<0.000000e+00> : vector<64x128xf32>
    %125 = tpu.matmul %122, %124, %cst_55 {dimension_numbers = #tpu.dot_dimension_numbers<[1], [0], [0], [1], [0, 0, 1, 1], [], []>} : vector<64x128xf32>, vector<128x128xf32>, vector<64x128xf32> -> vector<64x128xf32>
    %c7_56 = arith.constant 7 : index
    %c0_57 = arith.constant 0 : index
    %126 = vector.load %arg3[%c7_56, %c0_57] : memref<11x128xf32, #tpu.memory_space<vmem>>, vector<1x128xf32>
    %127 = vector.shape_cast %126 : vector<1x128xf32> to vector<128xf32>
    %128 = vector.shape_cast %127 : vector<128xf32> to vector<1x128xf32>
    %129 = vector.broadcast %128 : vector<1x128xf32> to vector<64x128xf32>
    %130 = arith.addf %125, %129 : vector<64x128xf32>
    %cst_58 = arith.constant 0.000000e+00 : f32
    %131 = vector.broadcast %cst_58 : f32 to vector<64x128xf32>
    %132 = arith.cmpf oge, %130, %131 : vector<64x128xf32>
    %cst_59 = arith.constant 1.000000e-01 : f32
    %133 = vector.broadcast %cst_59 : f32 to vector<64x128xf32>
    %134 = arith.mulf %133, %130 : vector<64x128xf32>
    %135 = arith.select %132, %130, %134 : vector<64x128xi1>, vector<64x128xf32>
    %136 = vector.shape_cast %135 : vector<64x128xf32> to vector<8x8x128xf32>
    %cst_60 = arith.constant dense<0.000000e+00> : vector<8x128xf32>
    %137 = vector.multi_reduction <add>, %136, %cst_60 [1] : vector<8x8x128xf32> to vector<8x128xf32>
    %c9 = arith.constant 9 : index
    %c0_61 = arith.constant 0 : index
    %c0_62 = arith.constant 0 : index
    %138 = vector.load %arg2[%c9, %c0_61, %c0_62] : memref<12x128x128xf32, #tpu.memory_space<vmem>>, vector<1x128x128xf32>
    %139 = vector.shape_cast %138 : vector<1x128x128xf32> to vector<128x128xf32>
    %cst_63 = arith.constant dense<0.000000e+00> : vector<8x128xf32>
    %140 = tpu.matmul %84, %139, %cst_63 {dimension_numbers = #tpu.dot_dimension_numbers<[1], [0], [0], [1], [0, 0, 1, 1], [], []>} : vector<8x128xf32>, vector<128x128xf32>, vector<8x128xf32> -> vector<8x128xf32>
    %c10 = arith.constant 10 : index
    %c0_64 = arith.constant 0 : index
    %c0_65 = arith.constant 0 : index
    %141 = vector.load %arg2[%c10, %c0_64, %c0_65] : memref<12x128x128xf32, #tpu.memory_space<vmem>>, vector<1x128x128xf32>
    %142 = vector.shape_cast %141 : vector<1x128x128xf32> to vector<128x128xf32>
    %cst_66 = arith.constant dense<0.000000e+00> : vector<8x128xf32>
    %143 = tpu.matmul %137, %142, %cst_66 {dimension_numbers = #tpu.dot_dimension_numbers<[1], [0], [0], [1], [0, 0, 1, 1], [], []>} : vector<8x128xf32>, vector<128x128xf32>, vector<8x128xf32> -> vector<8x128xf32>
    %144 = arith.addf %140, %143 : vector<8x128xf32>
    %c8_67 = arith.constant 8 : index
    %c0_68 = arith.constant 0 : index
    %145 = vector.load %arg3[%c8_67, %c0_68] : memref<11x128xf32, #tpu.memory_space<vmem>>, vector<1x128xf32>
    %146 = vector.shape_cast %145 : vector<1x128xf32> to vector<128xf32>
    %147 = vector.shape_cast %146 : vector<128xf32> to vector<1x128xf32>
    %148 = vector.broadcast %147 : vector<1x128xf32> to vector<8x128xf32>
    %149 = arith.addf %144, %148 : vector<8x128xf32>
    %cst_69 = arith.constant 0.000000e+00 : f32
    %150 = vector.broadcast %cst_69 : f32 to vector<8x128xf32>
    %151 = arith.cmpf oge, %149, %150 : vector<8x128xf32>
    %cst_70 = arith.constant 1.000000e-01 : f32
    %152 = vector.broadcast %cst_70 : f32 to vector<8x128xf32>
    %153 = arith.mulf %152, %149 : vector<8x128xf32>
    %154 = arith.select %151, %149, %153 : vector<8x128xi1>, vector<8x128xf32>
    %c11 = arith.constant 11 : index
    %c0_71 = arith.constant 0 : index
    %c0_72 = arith.constant 0 : index
    %155 = vector.load %arg2[%c11, %c0_71, %c0_72] : memref<12x128x128xf32, #tpu.memory_space<vmem>>, vector<1x128x128xf32>
    %156 = vector.shape_cast %155 : vector<1x128x128xf32> to vector<128x128xf32>
    %cst_73 = arith.constant dense<0.000000e+00> : vector<8x128xf32>
    %157 = tpu.matmul %154, %156, %cst_73 {dimension_numbers = #tpu.dot_dimension_numbers<[1], [0], [0], [1], [0, 0, 1, 1], [], []>} : vector<8x128xf32>, vector<128x128xf32>, vector<8x128xf32> -> vector<8x128xf32>
    %c9_74 = arith.constant 9 : index
    %c0_75 = arith.constant 0 : index
    %158 = vector.load %arg3[%c9_74, %c0_75] : memref<11x128xf32, #tpu.memory_space<vmem>>, vector<1x128xf32>
    %159 = vector.shape_cast %158 : vector<1x128xf32> to vector<128xf32>
    %160 = vector.shape_cast %159 : vector<128xf32> to vector<1x128xf32>
    %161 = vector.broadcast %160 : vector<1x128xf32> to vector<8x128xf32>
    %162 = arith.addf %157, %161 : vector<8x128xf32>
    %cst_76 = arith.constant 0.000000e+00 : f32
    %163 = vector.broadcast %cst_76 : f32 to vector<8x128xf32>
    %164 = arith.cmpf oge, %162, %163 : vector<8x128xf32>
    %cst_77 = arith.constant 1.000000e-01 : f32
    %165 = vector.broadcast %cst_77 : f32 to vector<8x128xf32>
    %166 = arith.mulf %165, %162 : vector<8x128xf32>
    %167 = arith.select %164, %162, %166 : vector<8x128xi1>, vector<8x128xf32>
    %168 = vector.shape_cast %167 : vector<8x128xf32> to vector<1x1024xf32>
    %c0_78 = arith.constant 0 : index
    %c0_79 = arith.constant 0 : index
    %169 = vector.load %arg4[%c0_78, %c0_79] : memref<1024x128xf32, #tpu.memory_space<vmem>>, vector<1024x128xf32>
    %cst_80 = arith.constant dense<0.000000e+00> : vector<1x128xf32>
    %170 = tpu.matmul %168, %169, %cst_80 {dimension_numbers = #tpu.dot_dimension_numbers<[1], [0], [0], [1], [0, 0, 1, 1], [], []>} : vector<1x1024xf32>, vector<1024x128xf32>, vector<1x128xf32> -> vector<1x128xf32>
    %c10_81 = arith.constant 10 : index
    %c0_82 = arith.constant 0 : index
    %171 = vector.load %arg3[%c10_81, %c0_82] : memref<11x128xf32, #tpu.memory_space<vmem>>, vector<1x128xf32>
    %172 = vector.shape_cast %171 : vector<1x128xf32> to vector<128xf32>
    %173 = vector.shape_cast %172 : vector<128xf32> to vector<1x128xf32>
    %174 = arith.addf %170, %173 : vector<1x128xf32>
    %c0_83 = arith.constant 0 : index
    %c0_84 = arith.constant 0 : index
    %c0_85 = arith.constant 0 : index
    %175 = vector.load %arg5[%c0_83, %c0_84, %c0_85] : memref<1x1x128xf32, #tpu.memory_space<vmem>>, vector<1x1x128xf32>
    %176 = vector.shape_cast %175 : vector<1x1x128xf32> to vector<1x128xf32>
    %177 = vector.shape_cast %174 : vector<1x128xf32> to vector<1x1x128xf32>
    tpu.vector_store %arg5[%c0_83, %c0_84, %c0_85], %177 {strides = array<i32>} : memref<1x1x128xf32, #tpu.memory_space<vmem>>, vector<1x1x128xf32>,
    return
  }
  func.func @transform_0(%arg0: i32) -> (i32, i32, i32) {
    %c0_i32 = arith.constant 0 : i32
    %c0_i32_0 = arith.constant 0 : i32
    %c0_i32_1 = arith.constant 0 : i32
    return %arg0, %c0_i32, %c0_i32_0 : i32, i32, i32
  }
  func.func @transform_1(%arg0: i32) -> (i32, i32, i32) {
    %c0_i32 = arith.constant 0 : i32
    %c0_i32_0 = arith.constant 0 : i32
    %c0_i32_1 = arith.constant 0 : i32
    %c0_i32_2 = arith.constant 0 : i32
    return %c0_i32, %c0_i32_0, %c0_i32_1 : i32, i32, i32
  }
  func.func @transform_2(%arg0: i32) -> (i32, i32) {
    %c0_i32 = arith.constant 0 : i32
    %c0_i32_0 = arith.constant 0 : i32
    %c0_i32_1 = arith.constant 0 : i32
    return %c0_i32, %c0_i32_0 : i32, i32
  }
  func.func @transform_3(%arg0: i32) -> (i32, i32) {
    %c0_i32 = arith.constant 0 : i32
    %c0_i32_0 = arith.constant 0 : i32
    %c0_i32_1 = arith.constant 0 : i32
    return %c0_i32, %c0_i32_0 : i32, i32
  }
  func.func @transform_4(%arg0: i32) -> (i32, i32, i32) {
    %c0_i32 = arith.constant 0 : i32
    %c0_i32_0 = arith.constant 0 : i32
    %c0_i32_1 = arith.constant 0 : i32
    return %arg0, %c0_i32, %c0_i32_0 : i32, i32, i32
  }
}

</mosaic_0001>

<bundles_post_ra>
// kernel: encoder_forward.1
= control target key start
LH: loop header
LB: loop body
LE: loop exit
PB: predicated region body
PF: predicated region fallthrough
CT: control target
= control target key end

     0   :  { %9 = vsyncpa [#allocation3], 0  ;;  %s4898_s0 = inlined_call_operand.vmem [shape: f32[2,8,128], index: 0, kind: input, shape index: {}]   ;;  %s4899_s1 = inlined_call_operand.hbm [shape: f32[12,128,128], index: 1, kind: input, shape index: {}]   ;;  %s4900_s2 = inlined_call_operand.vmem [shape: f32[11,128], index: 2, kind: input, shape index: {}]   ;;  %s4901_s3 = inlined_call_operand.hbm [shape: f32[1024,128], index: 3, kind: input, shape index: {}]   ;;  %s4902_s4 = inlined_call_operand.hbm [shape: f32[2,1,128], index: 4, kind: output, shape index: {}]  }
   0x1   :  { %10 = vsyncpa [#allocation6], 0 }
   0x2   :  { %11 = vsyncpa [#allocation4], 0 }
   0x3   :  { %13 = vsyncpa [#allocation4 + $0x1], 0  ;;  %s4283_s15 = smov 0   ;;  %s4285_s16 = smov 0  }
   0x4   :  { %s4287_s17 = smov 0   ;;  %s4289_s18 = smov 0  }
   0x5 LB: > { %s4304_s19 = sadd.s32 4294967295, %s4247_s18   ;;  %s2772_s20 = sadd.s32 4294967294, %s4247_s18   ;;  %s4247_s18 = sphi %s4289_s18, %s4928_s18   ;;  %s4243_s17 = sphi %s4287_s17, %s4927_s17   ;;  %s4239_s16 = sphi %s4285_s16, %s4926_s16   ;;  %s4235_s15 = sphi %s4283_s15, %s4925_s15  }
   0x6   : > { %s4308_s21 = sadd.s32 1, %s4247_s18   ;;  %s115_s22 = sadd.s32 1, %s4243_s17 }
   0x7   : > { %s112_s23 = ssub.s32 %s4247_s18, %s4308_s21  ;;  %p125_p0 = scmp.ne.s32.totalorder %s4243_s17, %s4239_s16 }
   0x8   : > { %p113_p1 = scmp.eq.s32.totalorder %s112_s23, 0  ;;  %p126_p2 = scmp.eq.s32.totalorder %s4304_s19, 1 }
   0x9   : > { %p131_p3 = scmp.ne.s32.totalorder %s4239_s16, %s4235_s15  ;;  %p132_p4 = scmp.eq.s32.totalorder %s2772_s20, 1 }
   0xa   : > { %s4319_s24 = scalar_select %p113_p1, %s4243_s17, %s115_s22  }
   0xb   : > { %p4321_p5 = por %p126_p2, %p125_p0  ;;  %p4325_p6 = por %p132_p4, %p131_p3 }
   0xc   : > { %p2773_p7 = scmp.ge.s32.totalorder %s4247_s18, 1  ;;  %p139_p8 = scmp.lt.s32.totalorder %s4247_s18, 3 }
   0xd   : > { %s4910_s25 = scalar_select %p4321_p5, 1, 0 }
   0xe   : > { %s4911_s26 = scalar_select %p4325_p6, 1, 0 }
   0xf   : > { %p4903_p9 = scmp.eq.s32.totalorder %s4304_s19, 0  ;;  %p4332_p10 = pnand %p2773_p7, %p139_p8 }
  0x10   : > { %s4249_s28 = smov [#allocation2]   ;;  %s4250_s5 = smov [#allocation5]  }
  0x11   : > { %s4912_s27 = scalar_select %p4332_p10, 1, 0 }
  0x12   : > { %s151_s29 = sshll.u32 %s4249_s28, 4  ;;  %p4032_p11 = pneg %p4332_p10  ;;  %s152_s29 = int_to_ptr.vmem [resolvable:$true] %s151_s29 }
  0x13   : > { %s167_s6 = sshll.u32 %s4250_s5, 4  ;;  %s4121_s9 = scalar_lea.hbm %s4899_s1, 24576  ;;  %s4344_s6 = int_to_ptr.vmem [resolvable:$true] %s167_s6 }
  0x14   : > { %p4340_p12 = pnand %p4903_p9, %p4032_p11  ;;  %p4122_p13 = scmp.ne.s32.totalorder %s4899_s1, %s4121_s9 }
  0x15   : > { %p4128_p3 = scmp.lt.u32.totalorder %s4121_s9, %s4899_s1 }
  0x16   : > { %p4123_p0 = pneg %p4340_p12 }
  0x18   : > { %p4124_p1 = pnand %p4123_p0, %p4122_p13 }
  0x1a   : > { %p4125_p2 = pneg %p4124_p1 }
  0x1c   : > { %p4130_p4 = pnand %p4128_p3, %p4125_p2 }
  0x1e   : > { %4133 = shalt.err (!%p4130_p4)
}
  0x1f   : > { %s4134_s14 = scalar_lea.vmem %s152_s29, 24576  ;;  %p4142_p9 = scmp.lt.s32.totalorder %s152_s29, %s152_s29 }
  0x20   : > { %p4135_p7 = scmp.ne.s32.totalorder %s152_s29, %s4134_s14  ;;  %p4143_p6 = scmp.lt.s32.totalorder %s4134_s14, %s4134_s14 }
  0x22   : > { %p4137_p8 = pnand %p4135_p7, %p4123_p0  ;;  %p4144_p5 = por %p4143_p6, %p4142_p9 }
  0x24   : > { %p4138_p11 = pneg %p4137_p8 }
  0x26   : > { %p4145_p10 = pnand %p4144_p5, %p4138_p11 }
  0x28   : > { %4148 = shalt.err (!%p4145_p10)
}
  0x29   : > { %s4251_s20 = smov 128   ;;  %s4252_s22 = smov 8  }
  0x2a   : > { %4035 = dma.hbm_to_vmem [thread:$0]  (!%p4340_p12), %s4899_s1, 24576, %s152_s29, [#allocation3], %s4251_s20, %s4251_s20, %s4252_s22  }
  0x2b   : > { %s4149_s8 = scalar_lea.hbm %s4901_s3, 16384 }
  0x2c   : > { %p4150_p13 = scmp.ne.s32.totalorder %s4901_s3, %s4149_s8  ;;  %p4156_p9 = scmp.lt.u32.totalorder %s4149_s8, %s4901_s3 }
  0x2e   : > { %p4152_p5 = pnand %p4150_p13, %p4123_p0 }
  0x30   : > { %p4153_p6 = pneg %p4152_p5 }
  0x32   : > { %p4158_p10 = pnand %p4156_p9, %p4153_p6 }
  0x34   : > { %4161 = shalt.err (!%p4158_p10)
}
  0x35   : > { %s4162_s29 = scalar_lea.vmem %s4344_s6, 16384  ;;  %p4170_p4 = scmp.lt.s32.totalorder %s4344_s6, %s4344_s6 }
  0x36   : > { %p4163_p1 = scmp.ne.s32.totalorder %s4344_s6, %s4162_s29  ;;  %p4171_p7 = scmp.lt.s32.totalorder %s4162_s29, %s4162_s29 }
  0x38   : > { %p4165_p2 = pnand %p4163_p1, %p4123_p0  ;;  %p4172_p8 = por %p4171_p7, %p4170_p4 }
  0x3a   : > { %p4166_p3 = pneg %p4165_p2 }
  0x3c   : > { %p4173_p11 = pnand %p4172_p8, %p4166_p3 }
  0x3e   : > { %4176 = shalt.err (!%p4173_p11)
}
  0x3f   : > { %4038 = dma.hbm_to_vmem [thread:$0]  (!%p4340_p12), %s4901_s3, 16384, %s4344_s6, [#allocation6], %s4251_s20, %s4251_s20, %s4252_s22  }
  0x40   : > { %p4914_p13 = scmp.ne.s32.totalorder %s4912_s27, 0 }
  0x41   : > { %p4915_p5 = scmp.eq.s32.totalorder (!%p4914_p13), %s4304_s19, 0 }
  0x42   : > { %190 = sbr.rel (%p4914_p13) target bundleno = 2209 (0x8a1), region = 36 }
  0x49   : > { %4222 = dma.done.wait (%p4915_p5), [#allocation3], 24576   ;;  %p4916_p0 = pmov %p4915_p5 }
  0x4b   : > { %4224 = vsyncadd (%p4916_p0), [#allocation3], 4294942720  ;;  %p4917_p6 = pmov %p4916_p0 }
  0x4c   : > { %p4918_p9 = pmov %p4916_p0 }
  0x4d   : > { %4226 = dma.done.wait (%p4917_p6), [#allocation6], 16384  }
  0x4e   : > { %4228 = vsyncadd (%p4918_p9), [#allocation6], 4294950912  ;;  %v4253_v0 = vmov 0.0|0.0   ;;  %vm4254_vm0 = vmmov 0   ;;  %v4255_v1 = vmov 0.0   ;;  %p218_p12 = scmp.lt.s32.totalorder %s4304_s19, 1  ;;  %v228_v4 = vlaneseq }
  0x4f   : > { %3590 = vmatprep.subr.bf16.mxu0 %v4253_v0  ;;  %3614 = vmatprep.subr.bf16.mxu1 %v4253_v0  ;;  %v4256_v2 = vmov 1966171168   ;;  %v401_v5 = vld [vmem:[#allocation2] sm:$0xff]  ;;  %v402_v6 = vld [vmem:[#allocation2 + $0x8] sm:$0xff]  ;;  %v403_v7 = vld [vmem:[#allocation2 + $0x10] sm:$0xff]  ;;  %s216_s9 = sand.u32 1, %s4239_s16  }
  0x50   : > { %3184 = vmatprep.mubr.msk.f32.mxu0 %vm4254_vm0, %v4255_v1  ;;  %3219 = vmatprep.mubr.msk.f32.mxu1 %vm4254_vm0, %v4255_v1  ;;  %v226_v3 = vunpack.c.l.s4 %v4256_v2  ;;  %s219_s27 = scalar_select %p218_p12, %s4304_s19, 1  ;;  %v3591_v8 = vpack.c.bf16 %v402_v6, %v401_v5  ;;  %v404_v9 = vld [vmem:[#allocation2 + $0x18] sm:$0xff]  ;;  %v488_v10 = vld [vmem:[#allocation2 + $0x80] sm:$0xff]  ;;  %v489_v11 = vld [vmem:[#allocation2 + $0x88] sm:$0xff]  ;;  %v4411_v17 = vshrl.u32 %v228_v4, 7 }
  0x51   : > { %v3615_v12 = vpack.c.bf16 %v489_v11, %v488_v10  ;;  %v490_v13 = vld [vmem:[#allocation2 + $0x90] sm:$0xff]  ;;  %v3594_v14 = vpack.c.bf16 %v404_v9, %v403_v7  ;;  %v491_v15 = vld [vmem:[#allocation2 + $0x98] sm:$0xff]  ;;  %v405_v18 = vld [vmem:[#allocation2 + $0x20] sm:$0xff]  ;;  %s2791_s10 = sshll.u32 %s4304_s19, 4  ;;  %s217_s11 = scalar_lea.vmem [#allocation7], %s216_s9 }
  0x52   : > { %3592 = vmatpush3.bf16.msra.mxu0 %v3591_v8  ;;  %v227_v16 = vunpack.c.0.s8 %v226_v3  ;;  %v406_v19 = vld [vmem:[#allocation2 + $0x28] sm:$0xff]  ;;  %v3618_v20 = vpack.c.bf16 %v491_v15, %v490_v13  ;;  %s2780_s30 = sshll.u32 %s219_s27, 3  ;;  %v492_v21 = vld [vmem:[#allocation2 + $0xa0] sm:$0xff]  ;;  %v407_v25 = vld [vmem:[#allocation2 + $0x30] sm:$0xff]  ;;  %v4428_v35 = vsub.s32 0, %v4411_v17  ;;  %s2695_s12 = sshll.u32 %s217_s11, 4  ;;  %s4858_s12 = int_to_ptr.vmem [resolvable:$true] %s2695_s12 }
  0x53   : > { %3593 = vmatprep.subr.bf16.mxu0 %v4253_v0  ;;  %3616 = vmatpush3.bf16.msra.mxu1 %v3615_v12  ;;  %v493_v22 = vld [vmem:[#allocation2 + $0xa8] sm:$0xff]  ;;  %v3597_v23 = vpack.c.bf16 %v406_v19, %v405_v18  ;;  %s221_s22 = scalar_lea.vmem %s4898_s0, %s2780_s30  ;;  %v408_v26 = vld [vmem:[#allocation2 + $0x38] sm:$0xff]  ;;  %v494_v28 = vld [vmem:[#allocation2 + $0xb0] sm:$0xff]  ;;  %s4856_s14 = scalar_lea.hbm %s4902_s4, %s2791_s10 }
  0x54   : > { %3617 = vmatprep.subr.bf16.mxu1 %v4253_v0  ;;  %v4419_v24 = vsub.s32 %v227_v16, %v4411_v17  ;;  %v3621_v27 = vpack.c.bf16 %v493_v22, %v492_v21  ;;  %v495_v29 = vld [vmem:[#allocation2 + $0xb8] sm:$0xff]  ;;  %v4423_v30 = vld [vmem:[%s221_s22] sm:$0xff]  ;;  %v3600_v31 = vpack.c.bf16 %v408_v26, %v407_v25  ;;  %v410_v33 = vld [vmem:[#allocation2 + $0x48] sm:$0xff]  ;;  %s2683_s27 = scalar_lea.sflag [#allocation4], %s216_s9  ;;  %s4177_s30 = scalar_lea.vmem %s4858_s12, 16 }
  0x55   : > { %v409_v32 = vld [vmem:[#allocation2 + $0x40] sm:$0xff]  ;;  %v224_v36 = vcombine.high %v4423_v30, %v4423_v30  ;;  %v3624_v37 = vpack.c.bf16 %v495_v29, %v494_v28  ;;  %v411_v38 = vld [vmem:[#allocation2 + $0x50] sm:$0xff]  ;;  %v412_v39 = vld [vmem:[#allocation2 + $0x58] sm:$0xff]  ;;  %p4178_p10 = scmp.ne.s32.totalorder %s4858_s12, %s4177_s30  ;;  %p4923_p1 = scmp.ne.s32.totalorder %s4910_s25, 0 }
  0x56   : > { %3595 = vmatpush3.bf16.msra.mxu0 %v3594_v14  ;;  %v231_v34 = vrot.slane %v4423_v30, %v4419_v24  ;;  %v496_v40 = vld [vmem:[#allocation2 + $0xc0] sm:$0xff]  ;;  %v497_v41 = vld [vmem:[#allocation2 + $0xc8] sm:$0xff]  ;;  %v3603_v45 = vpack.c.bf16 %v410_v33, %v409_v32  ;;  %v498_v46 = vld [vmem:[#allocation2 + $0xd0] sm:$0xff]  ;;  %v3606_v52 = vpack.c.bf16 %v412_v39, %v411_v38  ;;  %s4257_s19 = smov [#allocation7]  }
  0x57   : > { %3596 = vmatprep.subr.bf16.mxu0 %v4253_v0  ;;  %3619 = vmatpush3.bf16.msra.mxu1 %v3618_v20  ;;  %v238_v44 = vrot.slane %v224_v36, %v4419_v24  ;;  %v499_v47 = vld [vmem:[#allocation2 + $0xd8] sm:$0xff]  ;;  %v3627_v53 = vpack.c.bf16 %v497_v41, %v496_v40  ;;  %v413_v5 = vld [vmem:[#allocation2 + $0x60] sm:$0xff]  ;;  %v414_v6 = vld [vmem:[#allocation2 + $0x68] sm:$0xff]  ;;  %p4179_p2 = pnand %p4178_p10, %p4923_p1  ;;  %s4181_s6 = sshll.u32 %s4257_s19, 4  ;;  %s4182_s6 = int_to_ptr.vmem [resolvable:$false] %s4181_s6 }
  0x58   : > { %3620 = vmatprep.subr.bf16.mxu1 %v4253_v0  ;;  %v247_v42 = vrot.slane %v231_v34, %v4419_v24  ;;  %v239_v43 = vcombine.high %v231_v34, %v231_v34  ;;  %v3630_v59 = vpack.c.bf16 %v499_v47, %v498_v46  ;;  %v500_v10 = vld [vmem:[#allocation2 + $0xe0] sm:$0xff]  ;;  %v501_v11 = vld [vmem:[#allocation2 + $0xe8] sm:$0xff]  ;;  %v3609_v16 = vpack.c.bf16 %v414_v6, %v413_v5  ;;  %v415_v20 = vld [vmem:[#allocation2 + $0x70] sm:$0xff]  ;;  %s4183_s20 = scalar_lea.vmem %s4182_s6, 32  ;;  %p4184_p4 = scmp.lt.s32.totalorder %s4858_s12, %s4182_s6 }
  0x59   : > { %v254_v51 = vrot.slane %v238_v44, %v4419_v24  ;;  %v240_v54 = vcombine.high %v238_v44, %v238_v44  ;;  %v416_v21 = vld [vmem:[#allocation2 + $0x78] sm:$0xff]  ;;  %v3633_v22 = vpack.c.bf16 %v501_v11, %v500_v10  ;;  %v502_v25 = vld [vmem:[#allocation2 + $0xf0] sm:$0xff]  ;;  %v732_v38 = vld [vmem:[#allocation2 + $0x108] sm:$0xff]  ;;  %p4180_p3 = pneg %p4179_p2  ;;  %p4185_p7 = scmp.lt.s32.totalorder %s4183_s20, %s4177_s30 }
  0x5a   : > { %3598 = vmatpush3.bf16.msra.mxu0 %v3597_v23  ;;  %v276_v48 = vrot.slane %v247_v42, %v4428_v35  ;;  %v269_v49 = vcombine.high %v247_v42, %v247_v42  ;;  %v261_v50 = vrot.slane %v239_v43, %v4419_v24  ;;  %v503_v26 = vld [vmem:[#allocation2 + $0xf8] sm:$0xff]  ;;  %v3612_v29 = vpack.c.bf16 %v416_v21, %v415_v20  ;;  %v733_v40 = vld [vmem:[#allocation2 + $0x110] sm:$0xff]  ;;  %v735_v43 = vld [vmem:[#allocation2 + $0x120] sm:$0xff] }
  0x5b   : > { %3599 = vmatprep.subr.bf16.mxu0 %v4253_v0  ;;  %3622 = vmatpush3.bf16.msra.mxu1 %v3621_v27  ;;  %v292_v60 = vrot.slane %v254_v51, %v4428_v35  ;;  %v268_v61 = vrot.slane %v240_v54, %v4419_v24  ;;  %v270_v62 = vcombine.high %v254_v51, %v254_v51  ;;  %v734_v41 = vld [vmem:[#allocation2 + $0x118] sm:$0xff]  ;;  %v736_v44 = vld [vmem:[#allocation2 + $0x128] sm:$0xff]  ;;  %p4186_p8 = por %p4185_p7, %p4184_p4 }
  0x5c   : > { %3623 = vmatprep.subr.bf16.mxu1 %v4253_v0  ;;  %v313_v55 = vsub.f32 %v276_v48, %v4423_v30  ;;  %v284_v56 = vrot.slane %v269_v49, %v4428_v35  ;;  %v280_v57 = vrot.slane %v261_v50, %v4428_v35  ;;  %v271_v58 = vcombine.high %v261_v50, %v261_v50  ;;  %v738_v47 = vld [vmem:[#allocation2 + $0x138] sm:$0xff]  ;;  %v739_v49 = vld [vmem:[#allocation2 + $0x140] sm:$0xff]  ;;  %v740_v50 = vld [vmem:[#allocation2 + $0x148] sm:$0xff] }
  0x5d   : > { %v317_v7 = vsub.f32 %v292_v60, %v4423_v30  ;;  %v296_v8 = vrot.slane %v268_v61, %v4428_v35  ;;  %v300_v9 = vrot.slane %v270_v62, %v4428_v35  ;;  %v272_v15 = vcombine.high %v268_v61, %v268_v61  ;;  %p4187_p11 = pnand %p4186_p8, %p4180_p3 }
  0x5e   : > { %3601 = vmatpush3.bf16.msra.mxu0 %v3600_v31  ;;  %v321_v63 = vmul.f32 %v313_v55, %v313_v55  ;;  %v315_v2 = vsub.f32 %v284_v56, %v4423_v30  ;;  %v314_v3 = vsub.f32 %v280_v57, %v4423_v30  ;;  %v288_v4 = vrot.slane %v271_v58, %v4428_v35  ;;  %v743_v55 = vld [vmem:[#allocation2 + $0x160] sm:$0xff]  ;;  %v744_v56 = vld [vmem:[#allocation2 + $0x168] sm:$0xff]  ;;  %v745_v58 = vld [vmem:[#allocation2 + $0x170] sm:$0xff] }
  0x5f   : > { %3602 = vmatprep.subr.bf16.mxu0 %v4253_v0  ;;  %3625 = vmatpush3.bf16.msra.mxu1 %v3624_v37  ;;  %v318_v19 = vsub.f32 %v296_v8, %v4423_v30  ;;  %v304_v23 = vrot.slane %v272_v15, %v4428_v35  ;;  %v325_v27 = vmul.f32 %v317_v7, %v317_v7  ;;  %v731_v37 = vld [vmem:[#allocation2 + $0x100] sm:$0xff] }
  0x60   : > { %3626 = vmatprep.subr.bf16.mxu1 %v4253_v0  ;;  %329 = vadd.xlane.f32.xlu0 %v321_v63  ;;  %v323_v12 = vmul.f32 %v315_v2, %v315_v2  ;;  %v322_v13 = vmul.f32 %v314_v3, %v314_v3  ;;  %v316_v14 = vsub.f32 %v288_v4, %v4423_v30 }
  0x61   : > { %v319_v28 = vsub.f32 %v300_v9, %v4423_v30  ;;  %v326_v31 = vmul.f32 %v318_v19, %v318_v19  ;;  %v320_v32 = vsub.f32 %v304_v23, %v4423_v30  ;;  %v3636_v33 = vpack.c.bf16 %v503_v26, %v502_v25 }
  0x62   : > { %3604 = vmatpush3.bf16.msra.mxu0 %v3603_v45  ;;  %333 = vadd.xlane.f32.xlu1 %v323_v12  ;;  %v324_v18 = vmul.f32 %v316_v14, %v316_v14  ;;  %v3638_v39 = vpack.c.bf16 %v732_v38, %v731_v37  ;;  %v3642_v42 = vpack.c.bf16 %v734_v41, %v733_v40  ;;  %v737_v45 = vld [vmem:[#allocation2 + $0x130] sm:$0xff]  ;;  %v4517_v38 = vld [vmem:[%s4900_s2] ss:$0 sm:$0xff] }
  0x63   : > { %3605 = vmatprep.subr.bf16.mxu0 %v4253_v0  ;;  %3628 = vmatpush3.bf16.msra.mxu1 %v3627_v53  ;;  %v327_v34 = vmul.f32 %v319_v28, %v319_v28  ;;  %v328_v36 = vmul.f32 %v320_v32, %v320_v32  ;;  %v3646_v46 = vpack.c.bf16 %v736_v44, %v735_v43  ;;  %v742_v53 = vld [vmem:[#allocation2 + $0x158] sm:$0xff] }
  0x64   : > { %3629 = vmatprep.subr.bf16.mxu1 %v4253_v0  ;;  %331 = vadd.xlane.f32.xlu0 %v322_v13  ;;  %v3650_v48 = vpack.c.bf16 %v738_v47, %v737_v45  ;;  %v3654_v51 = vpack.c.bf16 %v740_v50, %v739_v49  ;;  %v3662_v57 = vpack.c.bf16 %v744_v56, %v743_v55 }
  0x66   : > { %3607 = vmatpush3.bf16.msra.mxu0 %v3606_v52  ;;  %335 = vadd.xlane.f32.xlu1 %v324_v18  ;;  %v741_v52 = vld [vmem:[#allocation2 + $0x150] sm:$0xff] }
  0x67   : > { %3608 = vmatprep.subr.bf16.mxu0 %v4253_v0  ;;  %3631 = vmatpush3.bf16.msra.mxu1 %v3630_v59  ;;  %v3658_v54 = vpack.c.bf16 %v742_v53, %v741_v52  ;;  %v746_v59 = vld [vmem:[#allocation2 + $0x178] sm:$0xff] }
  0x68   : > { %3632 = vmatprep.subr.bf16.mxu1 %v4253_v0  ;;  %337 = vadd.xlane.f32.xlu0 %v325_v27  ;;  %v3666_v60 = vpack.c.bf16 %v746_v59, %v745_v58 }
  0x6a   : > { %3610 = vmatpush3.bf16.msra.mxu0 %v3609_v16  ;;  %339 = vadd.xlane.f32.xlu1 %v326_v31 }
  0x6b   : > { %3611 = vmatprep.subr.bf16.mxu0 %v4253_v0  ;;  %3634 = vmatpush3.bf16.msra.mxu1 %v3633_v22 }
  0x6c   : > { %3635 = vmatprep.subr.bf16.mxu1 %v4253_v0  ;;  %341 = vadd.xlane.f32.xlu0 %v327_v34 }
  0x6e   : > { %3613 = vmatpush3.bf16.msra.mxu0 %v3612_v29  ;;  %343 = vadd.xlane.f32.xlu1 %v328_v36 }
  0x6f   : > { %3637 = vmatpush3.bf16.msra.mxu1 %v3636_v33  ;;  %3639 = vmatprep.subr.bf16.mxu0 %v3638_v39 }
  0x70   : > { %3670 = vmatprep.subr.bf16.mxu1 %v4253_v0 }
  0x71   : > { %3185 = vmatmul.mubr.f32.vlgmr.msra.gmra.mrb[0].mxu0 %v4423_v30 }
  0x72   : > { %3220 = vmatmul.mubr.f32.vlgmr.msra.gmra.mrb[0].mxu1 %v4423_v30  ;;  %3641 = vmatpush3.bf16.msra.mxu0 %v3638_v39 }
  0x73   : > { %3298 = vmatprep.mubr.msk.f32.mxu1 %vm4254_vm0, %v4255_v1  ;;  %3643 = vmatprep.subr.bf16.mxu0 %v3642_v42 }
  0x76   : > { %3645 = vmatpush3.bf16.msra.mxu0 %v3642_v42 }
  0x77   : > { %3647 = vmatprep.subr.bf16.mxu0 %v3646_v46 }
  0x7a   : > { %3649 = vmatpush3.bf16.msra.mxu0 %v3646_v46 }
  0x7b   : > { %3651 = vmatprep.subr.bf16.mxu0 %v3650_v48 }
  0x7e   : > { %3653 = vmatpush3.bf16.msra.mxu0 %v3650_v48 }
  0x7f   : > { %3655 = vmatprep.subr.bf16.mxu0 %v3654_v51 }
  0x82   : > { %3657 = vmatpush3.bf16.msra.mxu0 %v3654_v51 }
  0x83   : > { %3659 = vmatprep.subr.bf16.mxu0 %v3658_v54 }
  0x86   : > { %3661 = vmatpush3.bf16.msra.mxu0 %v3658_v54 }
  0x87   : > { %3663 = vmatprep.subr.bf16.mxu0 %v3662_v57 }
  0x8a   : > { %3665 = vmatpush3.bf16.msra.mxu0 %v3662_v57 }
  0x8b   : > { %3667 = vmatprep.subr.bf16.mxu0 %v3666_v60 }
  0x8e   : > { %3669 = vmatpush3.bf16.msra.mxu0 %v3666_v60 }
  0x8f   : > { %3694 = vmatprep.subr.bf16.mxu0 %v4253_v0 }
  0xed   : > { %v330_v61 = vpop.xlane.xlu0 %329 }
  0xee   : > { %4089 = vrsqrt.f32 %v330_v61  ;;  %vm347_vm1 = vcmp.eq.f32.partialorder %v330_v61, inf  ;;  %vm349_vm2 = vcmp.eq.f32.partialorder %v330_v61, 0.0  ;;  %v350_v14 = vand.u32 2147483648, %v330_v61 }
  0xef   : > { %v334_v62 = vpop.xlane.xlu1 %333 }
  0xf0   : > { %4091 = vrsqrt.f32 %v334_v62  ;;  %vm361_vm3 = vcmp.eq.f32.partialorder %v334_v62, inf  ;;  %vm363_vm4 = vcmp.eq.f32.partialorder %v334_v62, 0.0  ;;  %v364_v16 = vand.u32 2147483648, %v334_v62 }
  0xf1   : > { %v4469_v63 = vpop.xlane.xlu0 %331 }
  0xf2   : > { %4093 = vrsqrt.f32 %v4469_v63  ;;  %vm354_vm5 = vcmp.eq.f32.partialorder %v4469_v63, inf  ;;  %vm356_vm6 = vcmp.eq.f32.partialorder %v4469_v63, 0.0  ;;  %v357_v19 = vand.u32 2147483648, %v4469_v63 }
  0xf3   : > { %v4471_v2 = vpop.xlane.xlu1 %335 }
  0xf4   : > { %4095 = vrsqrt.f32 %v4471_v2  ;;  %vm368_vm7 = vcmp.eq.f32.partialorder %v4471_v2, inf  ;;  %vm370_vm8 = vcmp.eq.f32.partialorder %v4471_v2, 0.0  ;;  %v371_v26 = vand.u32 2147483648, %v4471_v2 }
  0xf5   : > { %v4473_v3 = vpop.xlane.xlu0 %337 }
  0xf6   : > { %4097 = vrsqrt.f32 %v4473_v3  ;;  %vm375_vm9 = vcmp.eq.f32.partialorder %v4473_v3, inf  ;;  %vm377_vm11 = vcmp.eq.f32.partialorder %v4473_v3, 0.0  ;;  %v378_v28 = vand.u32 2147483648, %v4473_v3 }
  0xf7   : > { %v4476_v4 = vpop.xlane.xlu1 %339 }
  0xf8   : > { %4099 = vrsqrt.f32 %v4476_v4  ;;  %v4090_v6 = vpop.eup %4089  ;;  %vm382_vm10 = vcmp.eq.f32.partialorder %v4476_v4, inf  ;;  %vm384_vm12 = vcmp.eq.f32.partialorder %v4476_v4, 0.0  ;;  %v385_v32 = vand.u32 2147483648, %v4476_v4 }
  0xf9   : > { %v4481_v5 = vpop.xlane.xlu0 %341  ;;  %v346_v13 = vmul.f32 %v4090_v6, %v330_v61 }
  0xfa   : > { %4101 = vrsqrt.f32 %v4481_v5  ;;  %v4092_v7 = vpop.eup %4091  ;;  %vm389_vm13 = vcmp.eq.f32.partialorder %v4481_v5, inf  ;;  %vm391_vm14 = vcmp.eq.f32.partialorder %v4481_v5, 0.0  ;;  %v392_v39 = vand.u32 2147483648, %v4481_v5 }
  0xfb   : > { %v4484_v8 = vpop.xlane.xlu1 %343  ;;  %v360_v15 = vmul.f32 %v4092_v7, %v334_v62  ;;  %v348_v25 = vsel %vm347_vm1, %v330_v61, %v346_v13 }
  0xfc   : > { %v4094_v9 = vpop.eup %4093  ;;  %4103 = vrsqrt.f32 %v4484_v8  ;;  %v351_v37 = vsel %vm349_vm2, %v350_v14, %v348_v25  ;;  %vm396_vm15 = vcmp.eq.f32.partialorder %v4484_v8, inf  ;;  %v399_v49 = vand.u32 2147483648, %v4484_v8 }
  0xfd   : > { %v353_v18 = vmul.f32 %v4094_v9, %v4469_v63  ;;  %v362_v27 = vsel %vm361_vm3, %v334_v62, %v360_v15  ;;  %v678_v51 = vmul.f32 %v4517_v38, %v351_v37  ;;  %vm398_vm1 = vcmp.eq.f32.partialorder %v4484_v8, 0.0 }
  0xfe   : > { %v4096_v10 = vpop.eup %4095  ;;  %v365_v41 = vsel %vm363_vm4, %v364_v16, %v362_v27 }
  0xff   : > { %v367_v20 = vmul.f32 %v4096_v10, %v4471_v2  ;;  %v355_v29 = vsel %vm354_vm5, %v4469_v63, %v353_v18  ;;  %v680_v60 = vmul.f32 %v4517_v38, %v365_v41 }
 0x100   : > { %v4098_v11 = vpop.eup %4097  ;;  %v358_v47 = vsel %vm356_vm6, %v357_v19, %v355_v29 }
 0x101   : > { %v374_v21 = vmul.f32 %v4098_v11, %v4473_v3  ;;  %v369_v31 = vsel %vm368_vm7, %v4471_v2, %v367_v20  ;;  %v679_v59 = vmul.f32 %v4517_v38, %v358_v47 }
 0x102   : > { %v4100_v12 = vpop.eup %4099  ;;  %v372_v48 = vsel %vm370_vm8, %v371_v26, %v369_v31 }
 0x103   : > { %v381_v22 = vmul.f32 %v4100_v12, %v4476_v4  ;;  %v376_v33 = vsel %vm375_vm9, %v4473_v3, %v374_v21  ;;  %v681_v61 = vmul.f32 %v4517_v38, %v372_v48 }
 0x104   : > { %v4102_v23 = vpop.eup %4101  ;;  %v379_v52 = vsel %vm377_vm11, %v378_v28, %v376_v33 }
 0x105   : > { %v383_v34 = vsel %vm382_vm10, %v4476_v4, %v381_v22  ;;  %v388_v36 = vmul.f32 %v4102_v23, %v4481_v5  ;;  %v682_v6 = vmul.f32 %v4517_v38, %v379_v52  ;;  %v2782_v22 = vld [vmem:[%s4900_s2 + $0x1] ss:$0 sm:$0xff] }
 0x106   : > { %v4104_v42 = vpop.eup %4103  ;;  %v386_v53 = vsel %vm384_vm12, %v385_v32, %v383_v34 }
 0x107   : > { %v390_v54 = vsel %vm389_vm13, %v4481_v5, %v388_v36  ;;  %v395_v58 = vmul.f32 %v4104_v42, %v4484_v8  ;;  %v683_v7 = vmul.f32 %v4517_v38, %v386_v53 }
 0x108   : > { %v393_v9 = vsel %vm391_vm14, %v392_v39, %v390_v54  ;;  %vm971_vm14 = vcmask 1041409  }
 0x109   : > { %v397_v14 = vsel %vm396_vm15, %v4484_v8, %v395_v58  ;;  %v684_v41 = vmul.f32 %v4517_v38, %v393_v9  ;;  %v931_v9 = vld [vmem:[#allocation2 + $0x188] sm:$0xff] }
 0x144   : > { %v483_v40 = vpop.f32.mrb[0].mxu0 }
 0x145   : > { %v577_v43 = vcombine.high %v483_v40, %v483_v40  ;;  %v584_v44 = vrot.slane %v483_v40, %v4419_v24  ;;  %v3186_v45 = vpop.f32.mrb[1].mxu0  ;;  %v570_v46 = vpop.f32.mrb[0].mxu1 }
 0x146   : > { %v3221_v50 = vpop.f32.mrb[1].mxu1 }
 0x147   : > { %v591_v55 = vrot.slane %v577_v43, %v4419_v24  ;;  %v592_v56 = vcombine.high %v584_v44, %v584_v44  ;;  %v600_v57 = vrot.slane %v584_v44, %v4419_v24 }
 0x149   : > { %v593_v62 = vcombine.high %v591_v55, %v591_v55  ;;  %v607_v63 = vrot.slane %v591_v55, %v4419_v24  ;;  %v614_v2 = vrot.slane %v592_v56, %v4419_v24  ;;  %v622_v3 = vcombine.high %v600_v57, %v600_v57 }
 0x14a   : > { %v629_v4 = vrot.slane %v600_v57, %v4428_v35 }
 0x14b   : > { %v621_v10 = vrot.slane %v593_v62, %v4419_v24  ;;  %v623_v11 = vcombine.high %v607_v63, %v607_v63  ;;  %v624_v12 = vcombine.high %v614_v2, %v614_v2  ;;  %v633_v13 = vrot.slane %v614_v2, %v4428_v35 }
 0x14c   : > { %v637_v15 = vrot.slane %v622_v3, %v4428_v35  ;;  %v645_v16 = vrot.slane %v607_v63, %v4428_v35  ;;  %v666_v18 = vadd.f32 %v629_v4, %v570_v46 }
 0x14d   : > { %v625_v19 = vcombine.high %v621_v10, %v621_v10  ;;  %v641_v20 = vrot.slane %v624_v12, %v4428_v35  ;;  %v649_v5 = vrot.slane %v621_v10, %v4428_v35  ;;  %v653_v21 = vrot.slane %v623_v11, %v4428_v35  ;;  %v947_v11 = vld [vmem:[#allocation2 + $0x200] sm:$0xff]  ;;  %v948_v12 = vld [vmem:[#allocation2 + $0x208] sm:$0xff] }
 0x14e   : > { %v686_v23 = vadd.f32 %v678_v51, %v666_v18  ;;  %v667_v25 = vadd.f32 %v633_v13, %v570_v46  ;;  %v668_v26 = vadd.f32 %v637_v15, %v570_v46  ;;  %v670_v27 = vadd.f32 %v645_v16, %v570_v46  ;;  %v933_v15 = vld [vmem:[#allocation2 + $0x198] sm:$0xff]  ;;  %v949_v18 = vld [vmem:[#allocation2 + $0x210] sm:$0xff] }
 0x14f   : > { %v657_v28 = vrot.slane %v625_v19, %v4428_v35  ;;  %v669_v29 = vadd.f32 %v641_v20, %v570_v46  ;;  %v671_v31 = vadd.f32 %v649_v5, %v570_v46  ;;  %v672_v32 = vadd.f32 %v653_v21, %v570_v46  ;;  %v950_v19 = vld [vmem:[#allocation2 + $0x218] sm:$0xff]  ;;  %v934_v5 = vld [vmem:[#allocation2 + $0x1a0] sm:$0xff]  ;;  %v935_v21 = vld [vmem:[#allocation2 + $0x1a8] sm:$0xff] }
 0x150   : > { %v698_v33 = vadd.f32 %v2782_v22, %v686_v23  ;;  %v687_v34 = vadd.f32 %v679_v59, %v667_v25  ;;  %v688_v36 = vadd.f32 %v680_v60, %v668_v26  ;;  %v690_v37 = vadd.f32 %v682_v6, %v670_v27  ;;  %v951_v23 = vld [vmem:[#allocation2 + $0x220] sm:$0xff]  ;;  %v952_v25 = vld [vmem:[#allocation2 + $0x228] sm:$0xff]  ;;  %v936_v27 = vld [vmem:[#allocation2 + $0x1b0] sm:$0xff] }
 0x151   : > { %v689_v39 = vadd.f32 %v681_v61, %v669_v29  ;;  %v691_v40 = vadd.f32 %v683_v7, %v671_v31  ;;  %v673_v42 = vadd.f32 %v657_v28, %v570_v46  ;;  %v692_v50 = vadd.f32 %v684_v41, %v672_v32  ;;  %v930_v7 = vld [vmem:[#allocation2 + $0x180] sm:$0xff]  ;;  %v937_v28 = vld [vmem:[#allocation2 + $0x1b8] sm:$0xff]  ;;  %v953_v31 = vld [vmem:[#allocation2 + $0x230] sm:$0xff] }
 0x152   : > { %vm706_vm2 = vcmp.ge.f32.partialorder %v698_v33, 0.0  ;;  %v714_v43 = vmul.f32 0.1, %v698_v33  ;;  %v699_v44 = vadd.f32 %v2782_v22, %v687_v34  ;;  %v700_v45 = vadd.f32 %v2782_v22, %v688_v36  ;;  %v954_v32 = vld [vmem:[#allocation2 + $0x238] sm:$0xff]  ;;  %v938_v34 = vld [vmem:[#allocation2 + $0x1c0] sm:$0xff]  ;;  %v939_v36 = vld [vmem:[#allocation2 + $0x1c8] sm:$0xff] }
 0x153   : > { %v701_v47 = vadd.f32 %v2782_v22, %v689_v39  ;;  %v702_v48 = vadd.f32 %v2782_v22, %v690_v37  ;;  %v400_v51 = vsel %vm398_vm1, %v399_v49, %v397_v14  ;;  %v703_v57 = vadd.f32 %v2782_v22, %v691_v40  ;;  %v932_v14 = vld [vmem:[#allocation2 + $0x190] sm:$0xff]  ;;  %v955_v39 = vld [vmem:[#allocation2 + $0x240] sm:$0xff]  ;;  %v956_v40 = vld [vmem:[#allocation2 + $0x248] sm:$0xff] }
 0x154   : > { %v722_v52 = vsel %vm706_vm2, %v698_v33, %v714_v43  ;;  %vm707_vm3 = vcmp.ge.f32.partialorder %v699_v44, 0.0  ;;  %v715_v53 = vmul.f32 0.1, %v699_v44  ;;  %vm708_vm4 = vcmp.ge.f32.partialorder %v700_v45, 0.0  ;;  %v941_v43 = vld [vmem:[#allocation2 + $0x1d8] sm:$0xff] }
 0x155   : > { %3254 = vmatprep.mubr.f32.mxu0 %v722_v52  ;;  %v716_v54 = vmul.f32 0.1, %v700_v45  ;;  %v717_v56 = vmul.f32 0.1, %v701_v47  ;;  %v685_v46 = vmul.f32 %v4517_v38, %v400_v51  ;;  %vm709_vm5 = vcmp.ge.f32.partialorder %v701_v47, 0.0  ;;  %v943_v51 = vld [vmem:[#allocation2 + $0x1e8] sm:$0xff] }
 0x156   : > { %v723_v55 = vsel %vm707_vm3, %v699_v44, %v715_v53  ;;  %v718_v59 = vmul.f32 0.1, %v702_v48  ;;  %v704_v60 = vadd.f32 %v2782_v22, %v692_v50  ;;  %vm710_vm6 = vcmp.ge.f32.partialorder %v702_v48, 0.0  ;;  %v942_v50 = vld [vmem:[#allocation2 + $0x1e0] sm:$0xff] }
 0x157   : > { %3255 = vmatmul.mubr.f32.vlgmr.msra.gmra.mrb[2].mxu0 %v723_v55  ;;  %v724_v58 = vsel %vm708_vm4, %v700_v45, %v716_v54  ;;  %v693_v8 = vadd.f32 %v685_v46, %v673_v42  ;;  %v725_v49 = vsel %vm709_vm5, %v701_v47, %v717_v56  ;;  %v719_v61 = vmul.f32 0.1, %v703_v57  ;;  %v940_v42 = vld [vmem:[#allocation2 + $0x1d0] sm:$0xff]  ;;  %v958_v47 = vld [vmem:[#allocation2 + $0x258] sm:$0xff]  ;;  %v959_v53 = vld [vmem:[#allocation2 + $0x260] sm:$0xff] }
 0x158   : > { %3257 = vmatprep.mubr.f32.mxu0 %v724_v58  ;;  %v726_v63 = vsel %vm710_vm6, %v702_v48, %v718_v59  ;;  %vm711_vm7 = vcmp.ge.f32.partialorder %v703_v57, 0.0  ;;  %v720_v2 = vmul.f32 0.1, %v704_v60  ;;  %vm712_vm8 = vcmp.ge.f32.partialorder %v704_v60, 0.0  ;;  %v957_v45 = vld [vmem:[#allocation2 + $0x250] sm:$0xff]  ;;  %v960_v54 = vld [vmem:[#allocation2 + $0x268] sm:$0xff] }
 0x159   : > { %v705_v62 = vadd.f32 %v2782_v22, %v693_v8  ;;  %v727_v3 = vsel %vm711_vm7, %v703_v57, %v719_v61  ;;  %v3695_v10 = vpack.c.bf16 %v931_v9, %v930_v7  ;;  %v3671_v13 = vpack.c.bf16 %v948_v12, %v947_v11  ;;  %v944_v56 = vld [vmem:[#allocation2 + $0x1f0] sm:$0xff]  ;;  %v945_v57 = vld [vmem:[#allocation2 + $0x1f8] sm:$0xff]  ;;  %v2783_v8 = vld [vmem:[%s4900_s2 + $0x2] ss:$0 sm:$0xff] }
 0x15a   : > { %v728_v38 = vsel %vm712_vm8, %v704_v60, %v720_v2  ;;  %v3698_v16 = vpack.c.bf16 %v933_v15, %v932_v14  ;;  %v3674_v20 = vpack.c.bf16 %v950_v19, %v949_v18  ;;  %v3701_v22 = vpack.c.bf16 %v935_v21, %v934_v5  ;;  %v961_v58 = vld [vmem:[#allocation2 + $0x270] sm:$0xff]  ;;  %v962_v59 = vld [vmem:[#allocation2 + $0x278] sm:$0xff] }
 0x15b   : > { %3258 = vmatmul.mubr.f32.gmra.mrb[4].mxu0 %v725_v49  ;;  %v721_v4 = vmul.f32 0.1, %v705_v62  ;;  %vm713_vm9 = vcmp.ge.f32.partialorder %v705_v62, 0.0  ;;  %3672 = vmatpush3.bf16.msra.mxu1 %v3671_v13  ;;  %v3677_v26 = vpack.c.bf16 %v952_v25, %v951_v23  ;;  %v3704_v29 = vpack.c.bf16 %v937_v28, %v936_v27 }
 0x15c   : > { %3260 = vmatprep.mubr.f32.mxu0 %v726_v63  ;;  %3696 = vmatpush3.bf16.msra.mxu0 %v3695_v10  ;;  %v3680_v33 = vpack.c.bf16 %v954_v32, %v953_v31  ;;  %v3707_v37 = vpack.c.bf16 %v939_v36, %v938_v34  ;;  %v3683_v41 = vpack.c.bf16 %v956_v40, %v955_v39  ;;  %vm973_vm3 = vcmask 1042434  }
 0x15d   : > { %v729_v6 = vsel %vm713_vm9, %v705_v62, %v721_v4  ;;  %3697 = vmatprep.subr.bf16.mxu0 %v4253_v0  ;;  %3673 = vmatprep.subr.bf16.mxu1 %v4253_v0  ;;  %v3710_v44 = vpack.c.bf16 %v941_v43, %v940_v42  ;;  %v3686_v48 = vpack.c.bf16 %v958_v47, %v957_v45  ;;  %vm975_vm5 = vcmask 1043459  }
 0x15e   : > { %v3713_v52 = vpack.c.bf16 %v943_v51, %v942_v50  ;;  %v3689_v55 = vpack.c.bf16 %v960_v54, %v959_v53  ;;  %v3716_v46 = vpack.c.bf16 %v945_v57, %v944_v56  ;;  %v3692_v60 = vpack.c.bf16 %v962_v59, %v961_v58 }
 0x15f   : > { %3261 = vmatmul.mubr.f32.gmra.mrb[6].mxu0 %v727_v3  ;;  %3675 = vmatpush3.bf16.msra.mxu1 %v3674_v20  ;;  %vm4909_vm6 = vcmask 1044484   ;;  %vm4908_vm7 = vcmask 1045509   ;;  %vm4907_vm8 = vcmask 1046534   ;;  %vm4906_vm9 = vcmask 1047559  }
 0x160   : > { %3263 = vmatprep.mubr.f32.mxu0 %v728_v38  ;;  %3699 = vmatpush3.bf16.msra.mxu0 %v3698_v16 }
 0x161   : > { %3700 = vmatprep.subr.bf16.mxu0 %v4253_v0  ;;  %3676 = vmatprep.subr.bf16.mxu1 %v4253_v0 }
 0x163   : > { %3264 = vmatmul.mubr.f32.gmra.mrb[8].mxu0 %v729_v6  ;;  %3678 = vmatpush3.bf16.msra.mxu1 %v3677_v26 }
 0x164   : > { %3333 = vmatprep.mubr.msk.f32.mxu0 %vm4254_vm0, %v4255_v1  ;;  %3702 = vmatpush3.bf16.msra.mxu0 %v3701_v22 }
 0x165   : > { %3703 = vmatprep.subr.bf16.mxu0 %v4253_v0  ;;  %3679 = vmatprep.subr.bf16.mxu1 %v4253_v0 }
 0x167   : > { %3681 = vmatpush3.bf16.msra.mxu1 %v3680_v33 }
 0x168   : > { %3705 = vmatpush3.bf16.msra.mxu0 %v3704_v29  ;;  %3682 = vmatprep.subr.bf16.mxu1 %v4253_v0 }
 0x169   : > { %3706 = vmatprep.subr.bf16.mxu0 %v4253_v0 }
 0x16b   : > { %3684 = vmatpush3.bf16.msra.mxu1 %v3683_v41 }
 0x16c   : > { %3708 = vmatpush3.bf16.msra.mxu0 %v3707_v37  ;;  %3685 = vmatprep.subr.bf16.mxu1 %v4253_v0 }
 0x16d   : > { %3709 = vmatprep.subr.bf16.mxu0 %v4253_v0 }
 0x16f   : > { %3687 = vmatpush3.bf16.msra.mxu1 %v3686_v48 }
 0x170   : > { %3711 = vmatpush3.bf16.msra.mxu0 %v3710_v44  ;;  %3688 = vmatprep.subr.bf16.mxu1 %v4253_v0 }
 0x171   : > { %3712 = vmatprep.subr.bf16.mxu0 %v4253_v0 }
 0x173   : > { %3690 = vmatpush3.bf16.msra.mxu1 %v3689_v55 }
 0x174   : > { %3714 = vmatpush3.bf16.msra.mxu0 %v3713_v52  ;;  %3691 = vmatprep.subr.bf16.mxu1 %v4253_v0 }
 0x175   : > { %3715 = vmatprep.subr.bf16.mxu0 %v4253_v0 }
 0x177   : > { %3693 = vmatpush3.bf16.msra.mxu1 %v3692_v60 }
 0x178   : > { %3717 = vmatpush3.bf16.msra.mxu0 %v3716_v46  ;;  %3718 = vmatprep.subr.bf16.mxu1 %v4253_v0 }
 0x179   : > { %3742 = vmatprep.subr.bf16.mxu0 %v4253_v0 }
 0x17b   : > { %3334 = vmatmul.mubr.f32.vlgmr.msra.gmra.mrb[10].mxu0 %v4423_v30 }
 0x17c   : > { %3403 = vmatprep.mubr.msk.f32.mxu0 %vm4254_vm0, %v4255_v1 }
 0x22a   : > { %v3256_v49 = vpop.f32.mrb[2].mxu0 }
 0x22b   : > { %v824_v61 = vadd.f32 %v3256_v49, %v2783_v8  ;;  %v818_v62 = vpop.f32.mrb[3].mxu0 }
 0x22c   : > { %v819_v63 = vadd.f32 %v2783_v8, %v818_v62 }
 0x22d   : > { %vm858_vm10 = vcmp.ge.f32.partialorder %v824_v61, 0.0  ;;  %v866_v2 = vmul.f32 0.1, %v824_v61 }
 0x22e   : > { %vm857_vm11 = vcmp.ge.f32.partialorder %v819_v63, 0.0  ;;  %v865_v3 = vmul.f32 0.1, %v819_v63  ;;  %v3259_v4 = vpop.f32.mrb[4].mxu0 }
 0x22f   : > { %v874_v38 = vsel %vm858_vm10, %v824_v61, %v866_v2  ;;  %v834_v6 = vadd.f32 %v3259_v4, %v2783_v8  ;;  %v828_v7 = vpop.f32.mrb[5].mxu0 }
 0x230   : > { %v887_v30 = vrot.slane %v874_v38, 4  ;;  %v873_v9 = vsel %vm857_vm11, %v819_v63, %v865_v3  ;;  %v829_v10 = vadd.f32 %v2783_v8, %v828_v7 }
 0x231   : > { %v881_v11 = vrot.slane %v873_v9, 4  ;;  %vm860_vm12 = vcmp.ge.f32.partialorder %v834_v6, 0.0  ;;  %v868_v12 = vmul.f32 0.1, %v834_v6 }
 0x232   : > { %v888_v13 = vadd.f32 %v887_v30, %v874_v38  ;;  %vm859_vm13 = vcmp.ge.f32.partialorder %v829_v10, 0.0  ;;  %v867_v14 = vmul.f32 0.1, %v829_v10  ;;  %v3262_v15 = vpop.f32.mrb[6].mxu0 }
 0x233   : > { %v882_v16 = vadd.f32 %v881_v11, %v873_v9  ;;  %v876_v18 = vsel %vm860_vm12, %v834_v6, %v868_v12  ;;  %v844_v19 = vadd.f32 %v3262_v15, %v2783_v8  ;;  %v838_v20 = vpop.f32.mrb[7].mxu0 }
 0x234   : > { %v889_v5 = vrot.slane %v888_v13, 2  ;;  %v899_v21 = vrot.slane %v876_v18, 4  ;;  %v875_v22 = vsel %vm859_vm13, %v829_v10, %v867_v14  ;;  %v839_v23 = vadd.f32 %v2783_v8, %v838_v20 }
 0x235   : > { %v883_v25 = vrot.slane %v882_v16, 2  ;;  %v893_v26 = vrot.slane %v875_v22, 4  ;;  %vm862_vm15 = vcmp.ge.f32.partialorder %v844_v19, 0.0  ;;  %v870_v27 = vmul.f32 0.1, %v844_v19 }
 0x236   : > { %v890_v28 = vadd.f32 %v889_v5, %v888_v13  ;;  %v900_v29 = vadd.f32 %v899_v21, %v876_v18  ;;  %vm861_vm1 = vcmp.ge.f32.partialorder %v839_v23, 0.0  ;;  %v869_v31 = vmul.f32 0.1, %v839_v23  ;;  %v3265_v32 = vpop.f32.mrb[8].mxu0 }
 0x237   : > { %v884_v33 = vadd.f32 %v883_v25, %v882_v16  ;;  %v894_v34 = vadd.f32 %v893_v26, %v875_v22  ;;  %v878_v36 = vsel %vm862_vm15, %v844_v19, %v870_v27  ;;  %v854_v37 = vadd.f32 %v3265_v32, %v2783_v8  ;;  %v848_v39 = vpop.f32.mrb[9].mxu0  ;;  %v1136_v22 = vld [vmem:[#allocation2 + $0x280] sm:$0xff] }
 0x238   : > { %v891_v40 = vrot.slane %v890_v28, 1  ;;  %v901_v41 = vrot.slane %v900_v29, 2  ;;  %v911_v42 = vrot.slane %v878_v36, 4  ;;  %v877_v43 = vsel %vm861_vm1, %v839_v23, %v869_v31  ;;  %v1137_v23 = vld [vmem:[#allocation2 + $0x288] sm:$0xff]  ;;  %v1139_v31 = vld [vmem:[#allocation2 + $0x298] sm:$0xff] }
 0x239   : > { %v885_v44 = vrot.slane %v884_v33, 1  ;;  %v895_v45 = vrot.slane %v894_v34, 2  ;;  %v905_v47 = vrot.slane %v877_v43, 4  ;;  %vm864_vm2 = vcmp.ge.f32.partialorder %v854_v37, 0.0 }
 0x23a   : > { %v892_v48 = vadd.f32 %v891_v40, %v890_v28  ;;  %v902_v50 = vadd.f32 %v901_v41, %v900_v29  ;;  %v912_v51 = vadd.f32 %v911_v42, %v878_v36  ;;  %v872_v52 = vmul.f32 0.1, %v854_v37  ;;  %v1138_v29 = vld [vmem:[#allocation2 + $0x290] sm:$0xff]  ;;  %v1141_v36 = vld [vmem:[#allocation2 + $0x2a8] sm:$0xff]  ;;  %v1143_v40 = vld [vmem:[#allocation2 + $0x2b8] sm:$0xff] }
 0x23b   : > { %v886_v53 = vadd.f32 %v885_v44, %v884_v33  ;;  %v896_v54 = vadd.f32 %v895_v45, %v894_v34  ;;  %v906_v55 = vadd.f32 %v905_v47, %v877_v43  ;;  %v849_v56 = vadd.f32 %v2783_v8, %v848_v39  ;;  %v1140_v34 = vld [vmem:[#allocation2 + $0x2a0] sm:$0xff]  ;;  %v1142_v39 = vld [vmem:[#allocation2 + $0x2b0] sm:$0xff]  ;;  %v1145_v43 = vld [vmem:[#allocation2 + $0x2c8] sm:$0xff] }
 0x23c   : > { %v903_v57 = vrot.slane %v902_v50, 1  ;;  %v913_v46 = vrot.slane %v912_v51, 2  ;;  %v880_v58 = vsel %vm864_vm2, %v854_v37, %v872_v52  ;;  %v3719_v27 = vpack.c.bf16 %v1137_v23, %v1136_v22  ;;  %v1144_v42 = vld [vmem:[#allocation2 + $0x2c0] sm:$0xff]  ;;  %v1146_v45 = vld [vmem:[#allocation2 + $0x2d0] sm:$0xff]  ;;  %v1147_v47 = vld [vmem:[#allocation2 + $0x2d8] sm:$0xff] }
 0x23d   : > { %v972_v59 = vsel %vm971_vm14, %v892_v48, %v886_v53  ;;  %v897_v60 = vrot.slane %v896_v54, 1  ;;  %v907_v49 = vrot.slane %v906_v55, 2  ;;  %v923_v61 = vrot.slane %v880_v58, 4  ;;  %v1498_v23 = vld [vmem:[#allocation2 + $0x390] sm:$0xff] }
 0x23e   : > { %v914_v62 = vadd.f32 %v913_v46, %v912_v51  ;;  %vm863_vm4 = vcmp.ge.f32.partialorder %v849_v56, 0.0  ;;  %v871_v63 = vmul.f32 0.1, %v849_v56  ;;  %v904_v38 = vadd.f32 %v903_v57, %v902_v50  ;;  %v1148_v50 = vld [vmem:[#allocation2 + $0x2e0] sm:$0xff]  ;;  %v1149_v51 = vld [vmem:[#allocation2 + $0x2e8] sm:$0xff] }
 0x23f   : > { %v898_v2 = vadd.f32 %v897_v60, %v896_v54  ;;  %v908_v3 = vadd.f32 %v907_v49, %v906_v55  ;;  %v924_v4 = vadd.f32 %v923_v61, %v880_v58  ;;  %v3722_v33 = vpack.c.bf16 %v1139_v31, %v1138_v29  ;;  %v1150_v55 = vld [vmem:[#allocation2 + $0x2f0] sm:$0xff]  ;;  %v1409_v46 = vld [vmem:[#allocation2 + $0x300] sm:$0xff]  ;;  %v1410_v58 = vld [vmem:[#allocation2 + $0x308] sm:$0xff] }
 0x240   : > { %v915_v6 = vrot.slane %v914_v62, 1  ;;  %v879_v7 = vsel %vm863_vm4, %v849_v56, %v871_v63  ;;  %v3725_v37 = vpack.c.bf16 %v1141_v36, %v1140_v34  ;;  %v3728_v41 = vpack.c.bf16 %v1143_v40, %v1142_v39  ;;  %v1151_v56 = vld [vmem:[#allocation2 + $0x2f8] sm:$0xff]  ;;  %v1411_v60 = vld [vmem:[#allocation2 + $0x310] sm:$0xff]  ;;  %v1414_v63 = vld [vmem:[#allocation2 + $0x328] sm:$0xff] }
 0x241   : > { %v974_v8 = vsel %vm973_vm3, %v898_v2, %v972_v59  ;;  %v909_v30 = vrot.slane %v908_v3, 1  ;;  %v925_v9 = vrot.slane %v924_v4, 2  ;;  %v917_v10 = vrot.slane %v879_v7, 4  ;;  %v1412_v49 = vld [vmem:[#allocation2 + $0x318] sm:$0xff]  ;;  %v1501_v29 = vld [vmem:[#allocation2 + $0x3a8] sm:$0xff]  ;;  %v1504_v36 = vld [vmem:[#allocation2 + $0x3c0] sm:$0xff] }
 0x242   : > { %v976_v11 = vsel %vm975_vm5, %v904_v38, %v974_v8  ;;  %v916_v14 = vadd.f32 %v915_v6, %v914_v62  ;;  %v3731_v44 = vpack.c.bf16 %v1145_v43, %v1144_v42  ;;  %v3734_v48 = vpack.c.bf16 %v1147_v47, %v1146_v45  ;;  %v1413_v62 = vld [vmem:[#allocation2 + $0x320] sm:$0xff]  ;;  %v1506_v40 = vld [vmem:[#allocation2 + $0x3d0] sm:$0xff] }
 0x243   : > { %v910_v12 = vadd.f32 %v909_v30, %v908_v3  ;;  %v918_v13 = vadd.f32 %v917_v10, %v879_v7  ;;  %v926_v15 = vadd.f32 %v925_v9, %v924_v4  ;;  %v3737_v53 = vpack.c.bf16 %v1149_v51, %v1148_v50  ;;  %v1415_v3 = vld [vmem:[#allocation2 + $0x330] sm:$0xff]  ;;  %v1416_v4 = vld [vmem:[#allocation2 + $0x338] sm:$0xff]  ;;  %v1417_v6 = vld [vmem:[#allocation2 + $0x340] sm:$0xff] }
 0x244   : > { %v3740_v57 = vpack.c.bf16 %v1151_v56, %v1150_v55  ;;  %v3743_v59 = vpack.c.bf16 %v1410_v58, %v1409_v46  ;;  %v3746_v61 = vpack.c.bf16 %v1412_v49, %v1411_v60  ;;  %v3749_v2 = vpack.c.bf16 %v1414_v63, %v1413_v62  ;;  %v1418_v7 = vld [vmem:[#allocation2 + $0x348] sm:$0xff]  ;;  %v1419_v30 = vld [vmem:[#allocation2 + $0x350] sm:$0xff]  ;;  %v1420_v9 = vld [vmem:[#allocation2 + $0x358] sm:$0xff] }
 0x245   : > { %v919_v16 = vrot.slane %v918_v13, 2  ;;  %v978_v18 = vsel %vm4909_vm6, %v910_v12, %v976_v11  ;;  %v927_v5 = vrot.slane %v926_v15, 1  ;;  %v3752_v38 = vpack.c.bf16 %v1416_v4, %v1415_v3  ;;  %v1421_v11 = vld [vmem:[#allocation2 + $0x360] sm:$0xff]  ;;  %v1422_v12 = vld [vmem:[#allocation2 + $0x368] sm:$0xff]  ;;  %v1423_v47 = vld [vmem:[#allocation2 + $0x370] sm:$0xff] }
 0x246   : > { %v980_v19 = vsel %vm4908_vm7, %v916_v14, %v978_v18  ;;  %3744 = vmatpush3.bf16.msra.mxu0 %v3743_v59  ;;  %v3755_v8 = vpack.c.bf16 %v1418_v7, %v1417_v6  ;;  %v3758_v10 = vpack.c.bf16 %v1420_v9, %v1419_v30  ;;  %v1508_v43 = vld [vmem:[#allocation2 + $0x3e0] sm:$0xff]  ;;  %v1510_v50 = vld [vmem:[#allocation2 + $0x3f0] sm:$0xff] }
 0x247   : > { %v920_v20 = vadd.f32 %v919_v16, %v918_v13  ;;  %v928_v26 = vadd.f32 %v927_v5, %v926_v15  ;;  %3745 = vmatprep.subr.bf16.mxu0 %v4253_v0  ;;  %v3761_v13 = vpack.c.bf16 %v1422_v12, %v1421_v11  ;;  %v2784_v15 = vld [vmem:[%s4900_s2 + $0x3] ss:$0 sm:$0xff] }
 0x249   : > { %v921_v21 = vrot.slane %v920_v20, 1 }
 0x24a   : > { %3747 = vmatpush3.bf16.msra.mxu0 %v3746_v61 }
 0x24b   : > { %v922_v25 = vadd.f32 %v921_v21, %v920_v20  ;;  %3748 = vmatprep.subr.bf16.mxu0 %v4253_v0  ;;  %v1497_v20 = vld [vmem:[#allocation2 + $0x388] sm:$0xff] }
 0x24d   : > { %v982_v28 = vsel %vm4907_vm8, %v922_v25, %v980_v19  ;;  %v1496_v19 = vld [vmem:[#allocation2 + $0x380] sm:$0xff]  ;;  %v1499_v25 = vld [vmem:[#allocation2 + $0x398] sm:$0xff] }
 0x24e   : > { %v984_v32 = vsel %vm4906_vm9, %v928_v26, %v982_v28  ;;  %v1122_v52 = vpop.f32.mrb[10].mxu0  ;;  %3750 = vmatpush3.bf16.msra.mxu0 %v3749_v2  ;;  %v3767_v22 = vpack.c.bf16 %v1497_v20, %v1496_v19  ;;  %v1500_v28 = vld [vmem:[#allocation2 + $0x3a0] sm:$0xff] }
 0x24f   : > { %3299 = vmatmul.mubr.f32.vlgmr.msra.gmra.mrb[2].mxu1 %v984_v32  ;;  %v3335_v54 = vpop.f32.mrb[11].mxu0  ;;  %3751 = vmatprep.subr.bf16.mxu0 %v4253_v0  ;;  %v3773_v31 = vpack.c.bf16 %v1501_v29, %v1500_v28  ;;  %v1502_v32 = vld [vmem:[#allocation2 + $0x3b0] sm:$0xff] }
 0x250   : > { %3720 = vmatpush3.bf16.msra.mxu1 %v3719_v27  ;;  %3368 = vmatprep.mubr.msk.f32.mxu1 %vm4254_vm0, %v4255_v1  ;;  %v3770_v27 = vpack.c.bf16 %v1499_v25, %v1498_v23  ;;  %v2785_v54 = vld [vmem:[%s4900_s2 + $0x4] ss:$0 sm:$0xff] }
 0x251   : > { %3721 = vmatprep.subr.bf16.mxu1 %v4253_v0 }
 0x252   : > { %3753 = vmatpush3.bf16.msra.mxu0 %v3752_v38 }
 0x253   : > { %3754 = vmatprep.subr.bf16.mxu0 %v4253_v0 }
 0x254   : > { %3723 = vmatpush3.bf16.msra.mxu1 %v3722_v33  ;;  %v1503_v33 = vld [vmem:[#allocation2 + $0x3b8] sm:$0xff] }
 0x255   : > { %3724 = vmatprep.subr.bf16.mxu1 %v4253_v0  ;;  %v3776_v34 = vpack.c.bf16 %v1503_v33, %v1502_v32 }
 0x256   : > { %3756 = vmatpush3.bf16.msra.mxu0 %v3755_v8 }
 0x257   : > { %3757 = vmatprep.subr.bf16.mxu0 %v4253_v0 }
 0x258   : > { %3726 = vmatpush3.bf16.msra.mxu1 %v3725_v37  ;;  %v1505_v37 = vld [vmem:[#allocation2 + $0x3c8] sm:$0xff] }
 0x259   : > { %3727 = vmatprep.subr.bf16.mxu1 %v4253_v0  ;;  %v3779_v39 = vpack.c.bf16 %v1505_v37, %v1504_v36  ;;  %v1740_v36 = vld [vmem:[#allocation2 + $0x408] sm:$0xff]  ;;  %v1741_v37 = vld [vmem:[#allocation2 + $0x410] sm:$0xff] }
 0x25a   : > { %3759 = vmatpush3.bf16.msra.mxu0 %v3758_v10 }
 0x25b   : > { %3760 = vmatprep.subr.bf16.mxu0 %v4253_v0 }
 0x25c   : > { %3729 = vmatpush3.bf16.msra.mxu1 %v3728_v41  ;;  %v1507_v41 = vld [vmem:[#allocation2 + $0x3d8] sm:$0xff] }
 0x25d   : > { %3730 = vmatprep.subr.bf16.mxu1 %v4253_v0  ;;  %v3782_v42 = vpack.c.bf16 %v1507_v41, %v1506_v40  ;;  %v1742_v40 = vld [vmem:[#allocation2 + $0x418] sm:$0xff] }
 0x25e   : > { %3762 = vmatpush3.bf16.msra.mxu0 %v3761_v13  ;;  %v3794_v41 = vpack.c.bf16 %v1742_v40, %v1741_v37  ;;  %v4728_v40 = vld [vmem:[%s4900_s2 + $0x5] ss:$0 sm:$0xff] }
 0x25f   : > { %3763 = vmatprep.subr.bf16.mxu0 %v4253_v0 }
 0x260   : > { %3732 = vmatpush3.bf16.msra.mxu1 %v3731_v44  ;;  %v1509_v44 = vld [vmem:[#allocation2 + $0x3e8] sm:$0xff] }
 0x261   : > { %3733 = vmatprep.subr.bf16.mxu1 %v4253_v0  ;;  %v3785_v45 = vpack.c.bf16 %v1509_v44, %v1508_v43  ;;  %v1744_v43 = vld [vmem:[#allocation2 + $0x428] sm:$0xff] }
 0x264   : > { %3735 = vmatpush3.bf16.msra.mxu1 %v3734_v48  ;;  %v1424_v48 = vld [vmem:[#allocation2 + $0x378] sm:$0xff] }
 0x265   : > { %3736 = vmatprep.subr.bf16.mxu1 %v4253_v0  ;;  %v3764_v51 = vpack.c.bf16 %v1424_v48, %v1423_v47  ;;  %v1746_v47 = vld [vmem:[#allocation2 + $0x438] sm:$0xff] }
 0x267   : > { %3765 = vmatpush3.bf16.msra.mxu0 %v3764_v51  ;;  %v1748_v51 = vld [vmem:[#allocation2 + $0x448] sm:$0xff] }
 0x268   : > { %3738 = vmatpush3.bf16.msra.mxu1 %v3737_v53 }
 0x269   : > { %3739 = vmatprep.subr.bf16.mxu1 %v4253_v0 }
 0x26c   : > { %3741 = vmatpush3.bf16.msra.mxu1 %v3740_v57 }
 0x26d   : > { %3766 = vmatprep.subr.bf16.mxu1 %v4253_v0 }
 0x322   : > { %v1052_v14 = vpop.f32.mrb[2].mxu1 }
 0x323   : > { %v1123_v16 = vadd.f32 %v1122_v52, %v1052_v14  ;;  %v3300_v18 = vpop.f32.mrb[3].mxu1  ;;  %v1511_v52 = vld [vmem:[#allocation2 + $0x3f8] sm:$0xff] }
 0x324   : > { %v3788_v53 = vpack.c.bf16 %v1511_v52, %v1510_v50  ;;  %v1747_v50 = vld [vmem:[#allocation2 + $0x440] sm:$0xff] }
 0x325   : > { %v1131_v5 = vadd.f32 %v2784_v15, %v1123_v16  ;;  %v3806_v52 = vpack.c.bf16 %v1748_v51, %v1747_v50 }
 0x327   : > { %v1133_v21 = vmul.f32 0.1, %v1131_v5  ;;  %vm1132_vm10 = vcmp.ge.f32.partialorder %v1131_v5, 0.0 }
 0x329   : > { %v1134_v26 = vsel %vm1132_vm10, %v1131_v5, %v1133_v21 }
 0x32a   : > { %3369 = vmatmul.mubr.f32.vlgmr.msra.gmra.mrb[4].mxu1 %v1134_v26 }
 0x32b   : > { %3768 = vmatpush3.bf16.msra.mxu1 %v3767_v22  ;;  %3438 = vmatprep.mubr.msk.f32.mxu1 %vm4254_vm0, %v4255_v1 }
 0x32c   : > { %3769 = vmatprep.subr.bf16.mxu1 %v4253_v0 }
 0x32f   : > { %3771 = vmatpush3.bf16.msra.mxu1 %v3770_v27 }
 0x330   : > { %3772 = vmatprep.subr.bf16.mxu1 %v4253_v0 }
 0x333   : > { %3774 = vmatpush3.bf16.msra.mxu1 %v3773_v31 }
 0x334   : > { %3775 = vmatprep.subr.bf16.mxu1 %v4253_v0 }
 0x337   : > { %3777 = vmatpush3.bf16.msra.mxu1 %v3776_v34  ;;  %v1739_v34 = vld [vmem:[#allocation2 + $0x400] sm:$0xff] }
 0x338   : > { %3778 = vmatprep.subr.bf16.mxu1 %v4253_v0 }
 0x33b   : > { %3780 = vmatpush3.bf16.msra.mxu1 %v3779_v39  ;;  %v3790_v39 = vpack.c.bf16 %v1740_v36, %v1739_v34 }
 0x33c   : > { %3781 = vmatprep.subr.bf16.mxu1 %v4253_v0 }
 0x33d   : > { %3791 = vmatprep.subr.bf16.mxu0 %v3790_v39 }
 0x33f   : > { %3783 = vmatpush3.bf16.msra.mxu1 %v3782_v42  ;;  %v1743_v42 = vld [vmem:[#allocation2 + $0x420] sm:$0xff] }
 0x340   : > { %3784 = vmatprep.subr.bf16.mxu1 %v4253_v0  ;;  %v3798_v44 = vpack.c.bf16 %v1744_v43, %v1743_v42 }
 0x343   : > { %3786 = vmatpush3.bf16.msra.mxu1 %v3785_v45  ;;  %v1745_v45 = vld [vmem:[#allocation2 + $0x430] sm:$0xff] }
 0x344   : > { %3787 = vmatprep.subr.bf16.mxu1 %v4253_v0  ;;  %v3802_v48 = vpack.c.bf16 %v1746_v47, %v1745_v45 }
 0x347   : > { %3789 = vmatpush3.bf16.msra.mxu1 %v3788_v53  ;;  %v1749_v53 = vld [vmem:[#allocation2 + $0x450] sm:$0xff] }
 0x348   : > { %3822 = vmatprep.subr.bf16.mxu1 %v4253_v0 }
 0x3fd   : > { %v1223_v55 = vpop.f32.mrb[4].mxu1 }
 0x3fe   : > { %v1224_v56 = vadd.f32 %v2785_v54, %v1223_v55  ;;  %v3370_v57 = vpop.f32.mrb[5].mxu1  ;;  %v1750_v54 = vld [vmem:[#allocation2 + $0x458] sm:$0xff] }
 0x3ff   : > { %v3810_v55 = vpack.c.bf16 %v1750_v54, %v1749_v53  ;;  %v1752_v57 = vld [vmem:[#allocation2 + $0x468] sm:$0xff] }
 0x400   : > { %vm1227_vm11 = vcmp.ge.f32.partialorder %v1224_v56, 0.0  ;;  %v1228_v46 = vmul.f32 0.1, %v1224_v56 }
 0x402   : > { %v4633_v58 = vsel %vm1227_vm11, %v1224_v56, %v1228_v46  ;;  %v1751_v56 = vld [vmem:[#allocation2 + $0x460] sm:$0xff] }
 0x403   : > { %3404 = vmatmul.mubr.f32.vlgmr.msra.gmra.mrb[12].mxu0 %v4633_v58  ;;  %3439 = vmatmul.mubr.f32.vlgmr.msra.gmra.mrb[6].mxu1 %v4633_v58  ;;  %v1238_v59 = vrot.slane %v4633_v58, %v4419_v24  ;;  %v1231_v60 = vcombine.high %v4633_v58, %v4633_v58  ;;  %v3814_v46 = vpack.c.bf16 %v1752_v57, %v1751_v56 }
 0x404   : > { %3517 = vmatprep.mubr.msk.f32.mxu1 %vm4254_vm0, %v4255_v1  ;;  %3793 = vmatpush3.bf16.msra.mxu0 %v3790_v39 }
 0x405   : > { %v1254_v49 = vrot.slane %v1238_v59, %v4419_v24  ;;  %v1246_v61 = vcombine.high %v1238_v59, %v1238_v59  ;;  %v1245_v62 = vrot.slane %v1231_v60, %v4419_v24  ;;  %3795 = vmatprep.subr.bf16.mxu0 %v3794_v41  ;;  %v1753_v59 = vld [vmem:[#allocation2 + $0x470] sm:$0xff]  ;;  %v1754_v60 = vld [vmem:[#allocation2 + $0x478] sm:$0xff] }
 0x407   : > { %v1283_v63 = vrot.slane %v1254_v49, %v4428_v35  ;;  %v1268_v2 = vrot.slane %v1246_v61, %v4419_v24  ;;  %v1276_v3 = vcombine.high %v1254_v49, %v1254_v49  ;;  %v1261_v4 = vrot.slane %v1245_v62, %v4419_v24 }
 0x408   : > { %v1247_v38 = vcombine.high %v1245_v62, %v1245_v62  ;;  %3797 = vmatpush3.bf16.msra.mxu0 %v3794_v41  ;;  %v3818_v49 = vpack.c.bf16 %v1754_v60, %v1753_v59 }
 0x409   : > { %v1320_v6 = vsub.f32 %v1283_v63, %v4633_v58  ;;  %v1287_v7 = vrot.slane %v1268_v2, %v4428_v35  ;;  %v1291_v8 = vrot.slane %v1276_v3, %v4428_v35  ;;  %v1278_v30 = vcombine.high %v1268_v2, %v1268_v2  ;;  %3799 = vmatprep.subr.bf16.mxu0 %v3798_v44 }
 0x40a   : > { %v1299_v9 = vrot.slane %v1261_v4, %v4428_v35  ;;  %v1275_v10 = vrot.slane %v1247_v38, %v4419_v24  ;;  %v1277_v11 = vcombine.high %v1261_v4, %v1261_v4 }
 0x40b   : > { %v1328_v12 = vmul.f32 %v1320_v6, %v1320_v6  ;;  %v1321_v13 = vsub.f32 %v1287_v7, %v4633_v58  ;;  %v1322_v14 = vsub.f32 %v1291_v8, %v4633_v58  ;;  %v1295_v15 = vrot.slane %v1278_v30, %v4428_v35  ;;  %v4685_v30 = vld [vmem:[#allocation2 + $0x480] sm:$0xff] }
 0x40c   : > { %v1303_v19 = vrot.slane %v1275_v10, %v4428_v35  ;;  %v1279_v20 = vcombine.high %v1275_v10, %v1275_v10  ;;  %v1324_v21 = vsub.f32 %v1299_v9, %v4633_v58  ;;  %v1307_v22 = vrot.slane %v1277_v11, %v4428_v35  ;;  %3801 = vmatpush3.bf16.msra.mxu0 %v3798_v44  ;;  %v4687_v9 = vld [vmem:[#allocation2 + $0x488] sm:$0xff] }
 0x40d   : > { %1336 = vadd.xlane.f32.xlu0 %v1328_v12  ;;  %v1329_v16 = vmul.f32 %v1321_v13, %v1321_v13  ;;  %v1323_v18 = vsub.f32 %v1295_v15, %v4633_v58  ;;  %v1330_v5 = vmul.f32 %v1322_v14, %v1322_v14  ;;  %3803 = vmatprep.subr.bf16.mxu0 %v3802_v48 }
 0x40e   : > { %v1325_v25 = vsub.f32 %v1303_v19, %v4633_v58  ;;  %v1311_v26 = vrot.slane %v1279_v20, %v4428_v35  ;;  %v1332_v27 = vmul.f32 %v1324_v21, %v1324_v21  ;;  %v1326_v28 = vsub.f32 %v1307_v22, %v4633_v58 }
 0x40f   : > { %1338 = vadd.xlane.f32.xlu1 %v1329_v16  ;;  %v1331_v23 = vmul.f32 %v1323_v18, %v1323_v18  ;;  %v3847_v13 = vpack.c.bf16 %v4687_v9, %v4685_v30  ;;  %v1944_v30 = vld [vmem:[#allocation2 + $0x4b0] sm:$0xff]  ;;  %v1945_v9 = vld [vmem:[#allocation2 + $0x4b8] sm:$0xff] }
 0x410   : > { %v1333_v29 = vmul.f32 %v1325_v25, %v1325_v25  ;;  %v1327_v31 = vsub.f32 %v1311_v26, %v4633_v58  ;;  %v1334_v32 = vmul.f32 %v1326_v28, %v1326_v28  ;;  %3805 = vmatpush3.bf16.msra.mxu0 %v3802_v48 }
 0x411   : > { %1340 = vadd.xlane.f32.xlu0 %v1330_v5  ;;  %3807 = vmatprep.subr.bf16.mxu0 %v3806_v52 }
 0x412   : > { %v1335_v33 = vmul.f32 %v1327_v31, %v1327_v31 }
 0x413   : > { %1342 = vadd.xlane.f32.xlu1 %v1331_v23 }
 0x414   : > { %3809 = vmatpush3.bf16.msra.mxu0 %v3806_v52 }
 0x415   : > { %1344 = vadd.xlane.f32.xlu0 %v1332_v27  ;;  %3811 = vmatprep.subr.bf16.mxu0 %v3810_v55 }
 0x417   : > { %1346 = vadd.xlane.f32.xlu1 %v1333_v29 }
 0x418   : > { %3813 = vmatpush3.bf16.msra.mxu0 %v3810_v55 }
 0x419   : > { %1348 = vadd.xlane.f32.xlu0 %v1334_v32  ;;  %3815 = vmatprep.subr.bf16.mxu0 %v3814_v46 }
 0x41b   : > { %1350 = vadd.xlane.f32.xlu1 %v1335_v33 }
 0x41c   : > { %3817 = vmatpush3.bf16.msra.mxu0 %v3814_v46 }
 0x41d   : > { %3819 = vmatprep.subr.bf16.mxu0 %v3818_v49 }
 0x420   : > { %3821 = vmatpush3.bf16.msra.mxu0 %v3818_v49 }
 0x421   : > { %3846 = vmatprep.subr.bf16.mxu0 %v4253_v0 }
 0x49a   : > { %v1337_v61 = vpop.xlane.xlu0 %1336 }
 0x49b   : > { %4105 = vrsqrt.f32 %v1337_v61  ;;  %vm1354_vm12 = vcmp.eq.f32.partialorder %v1337_v61, inf  ;;  %vm1356_vm13 = vcmp.eq.f32.partialorder %v1337_v61, 0.0  ;;  %v1357_v16 = vand.u32 2147483648, %v1337_v61 }
 0x49c   : > { %v4665_v62 = vpop.xlane.xlu1 %1338 }
 0x49d   : > { %4107 = vrsqrt.f32 %v4665_v62  ;;  %vm1361_vm15 = vcmp.eq.f32.partialorder %v4665_v62, inf  ;;  %vm1363_vm1 = vcmp.eq.f32.partialorder %v4665_v62, 0.0  ;;  %v1364_v19 = vand.u32 2147483648, %v4665_v62 }
 0x49e   : > { %v4667_v63 = vpop.xlane.xlu0 %1340 }
 0x49f   : > { %4109 = vrsqrt.f32 %v4667_v63  ;;  %vm1368_vm2 = vcmp.eq.f32.partialorder %v4667_v63, inf  ;;  %vm1370_vm4 = vcmp.eq.f32.partialorder %v4667_v63, 0.0  ;;  %v1371_v5 = vand.u32 2147483648, %v4667_v63 }
 0x4a0   : > { %v4669_v2 = vpop.xlane.xlu1 %1342 }
 0x4a1   : > { %4111 = vrsqrt.f32 %v4669_v2  ;;  %vm1375_vm10 = vcmp.eq.f32.partialorder %v4669_v2, inf  ;;  %vm1377_vm11 = vcmp.eq.f32.partialorder %v4669_v2, 0.0  ;;  %v1378_v27 = vand.u32 2147483648, %v4669_v2 }
 0x4a2   : > { %v4671_v3 = vpop.xlane.xlu0 %1344 }
 0x4a3   : > { %4113 = vrsqrt.f32 %v4671_v3  ;;  %vm1382_vm9 = vcmp.eq.f32.partialorder %v4671_v3, inf  ;;  %vm1384_vm8 = vcmp.eq.f32.partialorder %v4671_v3, 0.0  ;;  %v1385_v29 = vand.u32 2147483648, %v4671_v3 }
 0x4a4   : > { %v4675_v4 = vpop.xlane.xlu1 %1346 }
 0x4a5   : > { %4115 = vrsqrt.f32 %v4675_v4  ;;  %v4106_v6 = vpop.eup %4105  ;;  %vm1389_vm7 = vcmp.eq.f32.partialorder %v4675_v4, inf  ;;  %vm1391_vm6 = vcmp.eq.f32.partialorder %v4675_v4, 0.0  ;;  %v1392_v33 = vand.u32 2147483648, %v4675_v4 }
 0x4a6   : > { %v4680_v38 = vpop.xlane.xlu0 %1348  ;;  %v1353_v15 = vmul.f32 %v4106_v6, %v1337_v61 }
 0x4a7   : > { %4117 = vrsqrt.f32 %v4680_v38  ;;  %v4108_v7 = vpop.eup %4107  ;;  %v1399_v41 = vand.u32 2147483648, %v4680_v38 }
 0x4a8   : > { %v4683_v8 = vpop.xlane.xlu1 %1350  ;;  %v1360_v18 = vmul.f32 %v4108_v7, %v4665_v62  ;;  %v1355_v26 = vsel %vm1354_vm12, %v1337_v61, %v1353_v15  ;;  %vm1396_vm12 = vcmp.eq.f32.partialorder %v4680_v38, inf }
 0x4a9   : > { %v4110_v10 = vpop.eup %4109  ;;  %4119 = vrsqrt.f32 %v4683_v8  ;;  %v1358_v39 = vsel %vm1356_vm13, %v1357_v16, %v1355_v26  ;;  %v1406_v54 = vand.u32 2147483648, %v4683_v8  ;;  %v2787_v26 = vld [vmem:[%s4900_s2 + $0x6] ss:$0 sm:$0xff] }
 0x4aa   : > { %v1367_v20 = vmul.f32 %v4110_v10, %v4667_v63  ;;  %v1362_v28 = vsel %vm1361_vm15, %v4665_v62, %v1360_v18  ;;  %vm1398_vm15 = vcmp.eq.f32.partialorder %v4680_v38, 0.0  ;;  %v1686_v55 = vmul.f32 %v4728_v40, %v1358_v39 }
 0x4ab   : > { %v4112_v11 = vpop.eup %4111  ;;  %v1365_v44 = vsel %vm1363_vm1, %v1364_v19, %v1362_v28 }
 0x4ac   : > { %v1374_v21 = vmul.f32 %v4112_v11, %v4669_v2  ;;  %v1369_v31 = vsel %vm1368_vm2, %v4667_v63, %v1367_v20  ;;  %vm1403_vm2 = vcmp.eq.f32.partialorder %v4683_v8, inf  ;;  %v1687_v62 = vmul.f32 %v4728_v40, %v1365_v44 }
 0x4ad   : > { %v4114_v12 = vpop.eup %4113  ;;  %v1372_v52 = vsel %vm1370_vm4, %v1371_v5, %v1369_v31 }
 0x4ae   : > { %v1381_v22 = vmul.f32 %v4114_v12, %v4671_v3  ;;  %v1376_v32 = vsel %vm1375_vm10, %v4669_v2, %v1374_v21  ;;  %v1688_v63 = vmul.f32 %v4728_v40, %v1372_v52 }
 0x4af   : > { %v4116_v14 = vpop.eup %4115  ;;  %v1379_v53 = vsel %vm1377_vm11, %v1378_v27, %v1376_v32 }
 0x4b0   : > { %v1388_v23 = vmul.f32 %v4116_v14, %v4675_v4  ;;  %v1383_v34 = vsel %vm1382_vm9, %v4671_v3, %v1381_v22  ;;  %v1689_v2 = vmul.f32 %v4728_v40, %v1379_v53 }
 0x4b1   : > { %v4118_v25 = vpop.eup %4117  ;;  %v1386_v56 = vsel %vm1384_vm8, %v1385_v29, %v1383_v34 }
 0x4b2   : > { %v1390_v36 = vsel %vm1389_vm7, %v4675_v4, %v1388_v23  ;;  %v1395_v37 = vmul.f32 %v4118_v25, %v4680_v38  ;;  %v1690_v12 = vmul.f32 %v4728_v40, %v1386_v56 }
 0x4b3   : > { %v4120_v45 = vpop.eup %4119  ;;  %v1393_v57 = vsel %vm1391_vm6, %v1392_v33, %v1390_v36  ;;  %vm1405_vm6 = vcmp.eq.f32.partialorder %v4683_v8, 0.0 }
 0x4b4   : > { %v1397_v46 = vsel %vm1396_vm12, %v4680_v38, %v1395_v37  ;;  %v1402_v61 = vmul.f32 %v4120_v45, %v4683_v8  ;;  %v1691_v14 = vmul.f32 %v4728_v40, %v1393_v57 }
 0x4b5   : > { %v1400_v10 = vsel %vm1398_vm15, %v1399_v41, %v1397_v46 }
 0x4b6   : > { %v1404_v20 = vsel %vm1403_vm2, %v4683_v8, %v1402_v61  ;;  %v1941_v61 = vld [vmem:[#allocation2 + $0x498] sm:$0xff] }
 0x4b7   : > { %v1407_v53 = vsel %vm1405_vm6, %v1406_v54, %v1404_v20  ;;  %v3856_v20 = vpack.c.bf16 %v1945_v9, %v1944_v30 }
 0x4d6   : > { %v1491_v42 = vpop.f32.mrb[12].mxu0  ;;  %v1578_v43 = vpop.f32.mrb[6].mxu1 }
 0x4d7   : > { %v1585_v47 = vcombine.high %v1491_v42, %v1491_v42  ;;  %v1592_v48 = vrot.slane %v1491_v42, %v4419_v24  ;;  %v3405_v50 = vpop.f32.mrb[13].mxu0  ;;  %v3440_v51 = vpop.f32.mrb[7].mxu1 }
 0x4d9   : > { %v1599_v59 = vrot.slane %v1585_v47, %v4419_v24  ;;  %v1600_v60 = vcombine.high %v1592_v48, %v1592_v48  ;;  %v1608_v49 = vrot.slane %v1592_v48, %v4419_v24  ;;  %v1692_v47 = vmul.f32 %v4728_v40, %v1400_v10  ;;  %v1943_v10 = vld [vmem:[#allocation2 + $0x4a8] sm:$0xff] }
 0x4db   : > { %v1601_v3 = vcombine.high %v1599_v59, %v1599_v59  ;;  %v1615_v4 = vrot.slane %v1599_v59, %v4419_v24  ;;  %v1622_v6 = vrot.slane %v1600_v60, %v4419_v24  ;;  %v1630_v7 = vcombine.high %v1608_v49, %v1608_v49 }
 0x4dc   : > { %v1637_v11 = vrot.slane %v1608_v49, %v4428_v35  ;;  %v1940_v49 = vld [vmem:[#allocation2 + $0x490] sm:$0xff] }
 0x4dd   : > { %v1629_v15 = vrot.slane %v1601_v3, %v4419_v24  ;;  %v1631_v16 = vcombine.high %v1615_v4, %v1615_v4  ;;  %v1632_v18 = vcombine.high %v1622_v6, %v1622_v6  ;;  %v1641_v19 = vrot.slane %v1622_v6, %v4428_v35 }
 0x4de   : > { %v1645_v38 = vrot.slane %v1630_v7, %v4428_v35  ;;  %v1653_v5 = vrot.slane %v1615_v4, %v4428_v35  ;;  %v1674_v21 = vadd.f32 %v1637_v11, %v1578_v43  ;;  %v3850_v4 = vpack.c.bf16 %v1941_v61, %v1940_v49  ;;  %v1942_v7 = vld [vmem:[#allocation2 + $0x4a0] sm:$0xff]  ;;  %v1970_v49 = vld [vmem:[#allocation2 + $0x578] sm:$0xff] }
 0x4df   : > { %v1633_v22 = vcombine.high %v1629_v15, %v1629_v15  ;;  %v1649_v23 = vrot.slane %v1632_v18, %v4428_v35  ;;  %v1657_v25 = vrot.slane %v1629_v15, %v4428_v35  ;;  %v1661_v24 = vrot.slane %v1631_v16, %v4428_v35 }
 0x4e0   : > { %v1694_v27 = vadd.f32 %v1686_v55, %v1674_v21  ;;  %v1675_v28 = vadd.f32 %v1641_v19, %v1578_v43  ;;  %v1676_v29 = vadd.f32 %v1645_v38, %v1578_v43  ;;  %v1678_v31 = vadd.f32 %v1653_v5, %v1578_v43  ;;  %v1946_v38 = vld [vmem:[#allocation2 + $0x4c0] sm:$0xff]  ;;  %v1947_v5 = vld [vmem:[#allocation2 + $0x4c8] sm:$0xff] }
 0x4e1   : > { %v1665_v32 = vrot.slane %v1633_v22, %v4428_v35  ;;  %v1677_v33 = vadd.f32 %v1649_v23, %v1578_v43  ;;  %v1679_v34 = vadd.f32 %v1657_v25, %v1578_v43  ;;  %v1680_v36 = vadd.f32 %v1661_v24, %v1578_v43  ;;  %v1948_v23 = vld [vmem:[#allocation2 + $0x4d0] sm:$0xff]  ;;  %v1949_v25 = vld [vmem:[#allocation2 + $0x4d8] sm:$0xff] }
 0x4e2   : > { %v1706_v37 = vadd.f32 %v2787_v26, %v1694_v27  ;;  %v1695_v39 = vadd.f32 %v1687_v62, %v1675_v28  ;;  %v1696_v41 = vadd.f32 %v1688_v63, %v1676_v29  ;;  %v1698_v42 = vadd.f32 %v1690_v12, %v1678_v31  ;;  %v1951_v27 = vld [vmem:[#allocation2 + $0x4e8] sm:$0xff]  ;;  %v1952_v29 = vld [vmem:[#allocation2 + $0x4f0] sm:$0xff]  ;;  %v1953_v31 = vld [vmem:[#allocation2 + $0x4f8] sm:$0xff] }
 0x4e3   : > { %v1697_v44 = vadd.f32 %v1689_v2, %v1677_v33  ;;  %v1699_v45 = vadd.f32 %v1691_v14, %v1679_v34  ;;  %v1681_v48 = vadd.f32 %v1665_v32, %v1578_v43  ;;  %v1700_v57 = vadd.f32 %v1692_v47, %v1680_v36  ;;  %v1955_v33 = vld [vmem:[#allocation2 + $0x500] sm:$0xff]  ;;  %v1956_v34 = vld [vmem:[#allocation2 + $0x508] sm:$0xff]  ;;  %v1961_v47 = vld [vmem:[#allocation2 + $0x530] sm:$0xff] }
 0x4e4   : > { %vm1714_vm7 = vcmp.ge.f32.partialorder %v1706_v37, 0.0  ;;  %v1722_v50 = vmul.f32 0.1, %v1706_v37  ;;  %v1707_v51 = vadd.f32 %v2787_v26, %v1695_v39  ;;  %v1708_v52 = vadd.f32 %v2787_v26, %v1696_v41  ;;  %v1958_v39 = vld [vmem:[#allocation2 + $0x518] sm:$0xff] }
 0x4e5   : > { %v1709_v55 = vadd.f32 %v2787_v26, %v1697_v44  ;;  %v1710_v56 = vadd.f32 %v2787_v26, %v1698_v42  ;;  %v1711_v63 = vadd.f32 %v2787_v26, %v1699_v45  ;;  %v1693_v2 = vmul.f32 %v4728_v40, %v1407_v53  ;;  %v1959_v42 = vld [vmem:[#allocation2 + $0x520] sm:$0xff]  ;;  %v1960_v44 = vld [vmem:[#allocation2 + $0x528] sm:$0xff]  ;;  %v1965_v53 = vld [vmem:[#allocation2 + $0x550] sm:$0xff] }
 0x4e6   : > { %v1730_v46 = vsel %vm1714_vm7, %v1706_v37, %v1722_v50  ;;  %vm1715_vm8 = vcmp.ge.f32.partialorder %v1707_v51, 0.0  ;;  %v1723_v59 = vmul.f32 0.1, %v1707_v51  ;;  %vm1716_vm9 = vcmp.ge.f32.partialorder %v1708_v52, 0.0  ;;  %v1957_v37 = vld [vmem:[#allocation2 + $0x510] sm:$0xff]  ;;  %v1963_v50 = vld [vmem:[#allocation2 + $0x540] sm:$0xff] }
 0x4e7   : > { %3473 = vmatprep.mubr.f32.mxu0 %v1730_v46  ;;  %v1724_v60 = vmul.f32 0.1, %v1708_v52  ;;  %v1725_v43 = vmul.f32 0.1, %v1709_v55  ;;  %vm1717_vm13 = vcmp.ge.f32.partialorder %v1709_v55, 0.0  ;;  %v1712_v54 = vadd.f32 %v2787_v26, %v1700_v57  ;;  %v1967_v57 = vld [vmem:[#allocation2 + $0x560] sm:$0xff] }
 0x4e8   : > { %v1731_v62 = vsel %vm1715_vm8, %v1707_v51, %v1723_v59  ;;  %v1726_v8 = vmul.f32 0.1, %v1710_v56  ;;  %vm1718_vm1 = vcmp.ge.f32.partialorder %v1710_v56, 0.0  ;;  %v1701_v6 = vadd.f32 %v1693_v2, %v1681_v48  ;;  %v1964_v51 = vld [vmem:[#allocation2 + $0x548] sm:$0xff] }
 0x4e9   : > { %3474 = vmatmul.mubr.f32.vlgmr.msra.gmra.mrb[14].mxu0 %v1731_v62  ;;  %v1732_v3 = vsel %vm1716_vm9, %v1708_v52, %v1724_v60  ;;  %v1733_v11 = vsel %vm1717_vm13, %v1709_v55, %v1725_v43  ;;  %v1727_v12 = vmul.f32 0.1, %v1711_v63  ;;  %vm1719_vm4 = vcmp.ge.f32.partialorder %v1711_v63, 0.0  ;;  %v1966_v55 = vld [vmem:[#allocation2 + $0x558] sm:$0xff]  ;;  %v1968_v46 = vld [vmem:[#allocation2 + $0x568] sm:$0xff]  ;;  %v1969_v60 = vld [vmem:[#allocation2 + $0x570] sm:$0xff] }
 0x4ea   : > { %3848 = vmatpush3.bf16.msra.mxu0 %v3847_v13  ;;  %3476 = vmatprep.mubr.f32.mxu0 %v1732_v3  ;;  %v1713_v40 = vadd.f32 %v2787_v26, %v1701_v6  ;;  %v1734_v14 = vsel %vm1718_vm1, %v1710_v56, %v1726_v8  ;;  %v1728_v15 = vmul.f32 0.1, %v1712_v54  ;;  %v3853_v16 = vpack.c.bf16 %v1943_v10, %v1942_v7  ;;  %v1950_v26 = vld [vmem:[#allocation2 + $0x4e0] sm:$0xff] }
 0x4eb   : > { %3849 = vmatprep.subr.bf16.mxu0 %v4253_v0  ;;  %vm1720_vm10 = vcmp.ge.f32.partialorder %v1712_v54, 0.0  ;;  %v1735_v13 = vsel %vm1719_vm4, %v1711_v63, %v1727_v12  ;;  %v3859_v22 = vpack.c.bf16 %v1947_v5, %v1946_v38  ;;  %v3862_v24 = vpack.c.bf16 %v1949_v25, %v1948_v23  ;;  %v2788_v62 = vld [vmem:[%s4900_s2 + $0x7] ss:$0 sm:$0xff] }
 0x4ec   : > { %v1729_v18 = vmul.f32 0.1, %v1713_v40  ;;  %v1736_v19 = vsel %vm1720_vm10, %v1712_v54, %v1728_v15  ;;  %vm1721_vm11 = vcmp.ge.f32.partialorder %v1713_v40, 0.0  ;;  %v3865_v28 = vpack.c.bf16 %v1951_v27, %v1950_v26 }
 0x4ed   : > { %3477 = vmatmul.mubr.f32.gmra.mrb[16].mxu0 %v1733_v11  ;;  %v3868_v32 = vpack.c.bf16 %v1953_v31, %v1952_v29  ;;  %v3823_v36 = vpack.c.bf16 %v1956_v34, %v1955_v33  ;;  %v3826_v41 = vpack.c.bf16 %v1958_v39, %v1957_v37  ;;  %v3829_v45 = vpack.c.bf16 %v1960_v44, %v1959_v42 }
 0x4ee   : > { %3851 = vmatpush3.bf16.msra.mxu0 %v3850_v4  ;;  %3479 = vmatprep.mubr.f32.mxu0 %v1734_v14  ;;  %v1737_v21 = vsel %vm1721_vm11, %v1713_v40, %v1729_v18  ;;  %v3835_v52 = vpack.c.bf16 %v1964_v51, %v1963_v50  ;;  %v3838_v56 = vpack.c.bf16 %v1966_v55, %v1965_v53  ;;  %vm4920_vm1 = vcmask 1045509  }
 0x4ef   : > { %3852 = vmatprep.subr.bf16.mxu0 %v4253_v0  ;;  %3824 = vmatpush3.bf16.msra.mxu1 %v3823_v36  ;;  %v3841_v59 = vpack.c.bf16 %v1968_v46, %v1967_v57  ;;  %v3844_v61 = vpack.c.bf16 %v1970_v49, %v1969_v60 }
 0x4f0   : > { %3825 = vmatprep.subr.bf16.mxu1 %v4253_v0 }
 0x4f1   : > { %3480 = vmatmul.mubr.f32.gmra.mrb[18].mxu0 %v1735_v13 }
 0x4f2   : > { %3854 = vmatpush3.bf16.msra.mxu0 %v3853_v16  ;;  %3482 = vmatprep.mubr.f32.mxu0 %v1736_v19 }
 0x4f3   : > { %3855 = vmatprep.subr.bf16.mxu0 %v4253_v0  ;;  %3827 = vmatpush3.bf16.msra.mxu1 %v3826_v41 }
 0x4f4   : > { %3828 = vmatprep.subr.bf16.mxu1 %v4253_v0 }
 0x4f5   : > { %3483 = vmatmul.mubr.f32.gmra.mrb[20].mxu0 %v1737_v21 }
 0x4f6   : > { %3857 = vmatpush3.bf16.msra.mxu0 %v3856_v20  ;;  %3552 = vmatprep.mubr.msk.f32.mxu0 %vm4254_vm0, %v4255_v1 }
 0x4f7   : > { %3858 = vmatprep.subr.bf16.mxu0 %v4253_v0  ;;  %3830 = vmatpush3.bf16.msra.mxu1 %v3829_v45 }
 0x4f8   : > { %3831 = vmatprep.subr.bf16.mxu1 %v4253_v0 }
 0x4fa   : > { %3860 = vmatpush3.bf16.msra.mxu0 %v3859_v22 }
 0x4fb   : > { %3861 = vmatprep.subr.bf16.mxu0 %v4253_v0 }
 0x4fe   : > { %3863 = vmatpush3.bf16.msra.mxu0 %v3862_v24 }
 0x4ff   : > { %3864 = vmatprep.subr.bf16.mxu0 %v4253_v0 }
 0x502   : > { %3866 = vmatpush3.bf16.msra.mxu0 %v3865_v28 }
 0x503   : > { %3867 = vmatprep.subr.bf16.mxu0 %v4253_v0 }
 0x506   : > { %3869 = vmatpush3.bf16.msra.mxu0 %v3868_v32 }
 0x509   : > { %3553 = vmatmul.mubr.f32.vlgmr.msra.gmra.mrb[22].mxu0 %v4633_v58  ;;  %v1962_v58 = vld [vmem:[#allocation2 + $0x538] sm:$0xff] }
 0x50a   : > { %v3832_v48 = vpack.c.bf16 %v1962_v58, %v1961_v47 }
 0x50c   : > { %3833 = vmatpush3.bf16.msra.mxu1 %v3832_v48 }
 0x50d   : > { %3834 = vmatprep.subr.bf16.mxu1 %v4253_v0 }
 0x510   : > { %3836 = vmatpush3.bf16.msra.mxu1 %v3835_v52 }
 0x511   : > { %3837 = vmatprep.subr.bf16.mxu1 %v4253_v0 }
 0x514   : > { %3839 = vmatpush3.bf16.msra.mxu1 %v3838_v56 }
 0x515   : > { %3840 = vmatprep.subr.bf16.mxu1 %v4253_v0 }
 0x518   : > { %3842 = vmatpush3.bf16.msra.mxu1 %v3841_v59 }
 0x519   : > { %3843 = vmatprep.subr.bf16.mxu1 %v4253_v0 }
 0x51c   : > { %3845 = vmatpush3.bf16.msra.mxu1 %v3844_v61 }
 0x51d   : > { %3870 = vmatprep.subr.bf16.mxu1 %v4253_v0 }
 0x5bc   : > { %v3475_v43 = vpop.f32.mrb[14].mxu0 }
 0x5bd   : > { %v1832_v63 = vadd.f32 %v3475_v43, %v2788_v62  ;;  %v1826_v2 = vpop.f32.mrb[15].mxu0 }
 0x5be   : > { %v1827_v3 = vadd.f32 %v2788_v62, %v1826_v2 }
 0x5bf   : > { %vm1866_vm12 = vcmp.ge.f32.partialorder %v1832_v63, 0.0  ;;  %v1874_v8 = vmul.f32 0.1, %v1832_v63 }
 0x5c0   : > { %vm1865_vm15 = vcmp.ge.f32.partialorder %v1827_v3, 0.0  ;;  %v1873_v54 = vmul.f32 0.1, %v1827_v3  ;;  %v3478_v4 = vpop.f32.mrb[16].mxu0 }
 0x5c1   : > { %v1882_v6 = vsel %vm1866_vm12, %v1832_v63, %v1874_v8  ;;  %v1842_v7 = vadd.f32 %v3478_v4, %v2788_v62  ;;  %v1836_v10 = vpop.f32.mrb[17].mxu0 }
 0x5c2   : > { %v1895_v11 = vrot.slane %v1882_v6, 4  ;;  %v1881_v12 = vsel %vm1865_vm15, %v1827_v3, %v1873_v54  ;;  %v1837_v40 = vadd.f32 %v2788_v62, %v1836_v10 }
 0x5c3   : > { %v1889_v14 = vrot.slane %v1881_v12, 4  ;;  %vm1868_vm2 = vcmp.ge.f32.partialorder %v1842_v7, 0.0  ;;  %v1876_v15 = vmul.f32 0.1, %v1842_v7 }
 0x5c4   : > { %v1896_v16 = vadd.f32 %v1895_v11, %v1882_v6  ;;  %vm1867_vm6 = vcmp.ge.f32.partialorder %v1837_v40, 0.0  ;;  %v1875_v30 = vmul.f32 0.1, %v1837_v40  ;;  %v3481_v9 = vpop.f32.mrb[18].mxu0 }
 0x5c5   : > { %v1890_v13 = vadd.f32 %v1889_v14, %v1881_v12  ;;  %v1884_v18 = vsel %vm1868_vm2, %v1842_v7, %v1876_v15  ;;  %v1852_v19 = vadd.f32 %v3481_v9, %v2788_v62  ;;  %v1846_v20 = vpop.f32.mrb[19].mxu0 }
 0x5c6   : > { %v1897_v38 = vrot.slane %v1896_v16, 2  ;;  %v1907_v5 = vrot.slane %v1884_v18, 4  ;;  %v1883_v21 = vsel %vm1867_vm6, %v1837_v40, %v1875_v30  ;;  %v1847_v22 = vadd.f32 %v2788_v62, %v1846_v20 }
 0x5c7   : > { %v1891_v23 = vrot.slane %v1890_v13, 2  ;;  %v1901_v25 = vrot.slane %v1883_v21, 4  ;;  %vm1870_vm7 = vcmp.ge.f32.partialorder %v1852_v19, 0.0  ;;  %v1878_v24 = vmul.f32 0.1, %v1852_v19 }
 0x5c8   : > { %v1898_v26 = vadd.f32 %v1897_v38, %v1896_v16  ;;  %v1908_v27 = vadd.f32 %v1907_v5, %v1884_v18  ;;  %vm1869_vm8 = vcmp.ge.f32.partialorder %v1847_v22, 0.0  ;;  %v1877_v28 = vmul.f32 0.1, %v1847_v22  ;;  %v3484_v29 = vpop.f32.mrb[20].mxu0  ;;  %v2137_v5 = vld [vmem:[#allocation2 + $0x580] sm:$0xff] }
 0x5c9   : > { %v1892_v31 = vadd.f32 %v1891_v23, %v1890_v13  ;;  %v1902_v32 = vadd.f32 %v1901_v25, %v1883_v21  ;;  %v1886_v33 = vsel %vm1870_vm7, %v1852_v19, %v1878_v24  ;;  %v1862_v34 = vadd.f32 %v3484_v29, %v2788_v62  ;;  %v1856_v36 = vpop.f32.mrb[21].mxu0  ;;  %v2138_v21 = vld [vmem:[#allocation2 + $0x588] sm:$0xff]  ;;  %v2140_v29 = vld [vmem:[#allocation2 + $0x598] sm:$0xff] }
 0x5ca   : > { %v1899_v37 = vrot.slane %v1898_v26, 1  ;;  %v1909_v39 = vrot.slane %v1908_v27, 2  ;;  %v1919_v41 = vrot.slane %v1886_v33, 4  ;;  %v1885_v42 = vsel %vm1869_vm8, %v1847_v22, %v1877_v28  ;;  %v2139_v28 = vld [vmem:[#allocation2 + $0x590] sm:$0xff] }
 0x5cb   : > { %v1893_v44 = vrot.slane %v1892_v31, 1  ;;  %v1903_v45 = vrot.slane %v1902_v32, 2  ;;  %v1913_v47 = vrot.slane %v1885_v42, 4  ;;  %vm1872_vm9 = vcmp.ge.f32.partialorder %v1862_v34, 0.0 }
 0x5cc   : > { %v1900_v58 = vadd.f32 %v1899_v37, %v1898_v26  ;;  %v1910_v48 = vadd.f32 %v1909_v39, %v1908_v27  ;;  %v1920_v50 = vadd.f32 %v1919_v41, %v1886_v33  ;;  %v1880_v51 = vmul.f32 0.1, %v1862_v34  ;;  %v2141_v33 = vld [vmem:[#allocation2 + $0x5a0] sm:$0xff]  ;;  %v2143_v37 = vld [vmem:[#allocation2 + $0x5b0] sm:$0xff]  ;;  %v2144_v39 = vld [vmem:[#allocation2 + $0x5b8] sm:$0xff] }
 0x5cd   : > { %v1894_v52 = vadd.f32 %v1893_v44, %v1892_v31  ;;  %v1904_v53 = vadd.f32 %v1903_v45, %v1902_v32  ;;  %v1914_v55 = vadd.f32 %v1913_v47, %v1885_v42  ;;  %v1857_v56 = vadd.f32 %v2788_v62, %v1856_v36  ;;  %v2145_v42 = vld [vmem:[#allocation2 + $0x5c0] sm:$0xff]  ;;  %v2146_v44 = vld [vmem:[#allocation2 + $0x5c8] sm:$0xff]  ;;  %v2148_v47 = vld [vmem:[#allocation2 + $0x5d8] sm:$0xff] }
 0x5ce   : > { %v1911_v57 = vrot.slane %v1910_v48, 1  ;;  %v1921_v46 = vrot.slane %v1920_v50, 2  ;;  %v1888_v59 = vsel %vm1872_vm9, %v1862_v34, %v1880_v51  ;;  %v3871_v26 = vpack.c.bf16 %v2138_v21, %v2137_v5  ;;  %v2142_v34 = vld [vmem:[#allocation2 + $0x5a8] sm:$0xff]  ;;  %v2257_v21 = vld [vmem:[#allocation5 + $0xd0] sm:$0xff] }
 0x5cf   : > { %v1979_v60 = vsel %vm971_vm14, %v1900_v58, %v1894_v52  ;;  %v1905_v49 = vrot.slane %v1904_v53, 1  ;;  %v1915_v61 = vrot.slane %v1914_v55, 2  ;;  %v1931_v43 = vrot.slane %v1888_v59, 4  ;;  %v2151_v52 = vld [vmem:[#allocation2 + $0x5f0] sm:$0xff] }
 0x5d0   : > { %v1922_v63 = vadd.f32 %v1921_v46, %v1920_v50  ;;  %vm1871_vm13 = vcmp.ge.f32.partialorder %v1857_v56, 0.0  ;;  %v1879_v2 = vmul.f32 0.1, %v1857_v56  ;;  %v1912_v4 = vadd.f32 %v1911_v57, %v1910_v48  ;;  %v2149_v48 = vld [vmem:[#allocation2 + $0x5e0] sm:$0xff]  ;;  %v2150_v50 = vld [vmem:[#allocation2 + $0x5e8] sm:$0xff] }
 0x5d1   : > { %v1906_v3 = vadd.f32 %v1905_v49, %v1904_v53  ;;  %v1916_v8 = vadd.f32 %v1915_v61, %v1914_v55  ;;  %v1932_v54 = vadd.f32 %v1931_v43, %v1888_v59  ;;  %vm4919_vm14 = vcmask 1044484   ;;  %v2152_v53 = vld [vmem:[#allocation2 + $0x5f8] sm:$0xff]  ;;  %v2248_v57 = vld [vmem:[#allocation5 + $0x88] sm:$0xff]  ;;  %v2279_v46 = vld [vmem:[#allocation5 + $0x180] sm:$0xff] }
 0x5d2   : > { %v1923_v6 = vrot.slane %v1922_v63, 1  ;;  %v1887_v7 = vsel %vm1871_vm13, %v1857_v56, %v1879_v2  ;;  %v3874_v32 = vpack.c.bf16 %v2140_v29, %v2139_v28  ;;  %v3877_v36 = vpack.c.bf16 %v2142_v34, %v2141_v33  ;;  %v2247_v56 = vld [vmem:[#allocation5 + $0x80] sm:$0xff]  ;;  %v2232_v61 = vld [vmem:[#allocation5 + $0x8] sm:$0xff]  ;;  %v2249_v2 = vld [vmem:[#allocation5 + $0x90] sm:$0xff] }
 0x5d3   : > { %v1980_v10 = vsel %vm973_vm3, %v1906_v3, %v1979_v60  ;;  %v1917_v62 = vrot.slane %v1916_v8, 1  ;;  %v1933_v11 = vrot.slane %v1932_v54, 2  ;;  %v1925_v12 = vrot.slane %v1887_v7, 4  ;;  %v2280_v60 = vld [vmem:[#allocation5 + $0x188] sm:$0xff]  ;;  %v2231_v49 = vld [vmem:[#allocation5] sm:$0xff]  ;;  %v2250_v3 = vld [vmem:[#allocation5 + $0x98] sm:$0xff] }
 0x5d4   : > { %v1981_v40 = vsel %vm975_vm5, %v1912_v4, %v1980_v10  ;;  %v1924_v16 = vadd.f32 %v1923_v6, %v1922_v63  ;;  %vm4921_vm3 = vcmask 1046534   ;;  %vm4922_vm5 = vcmask 1047559   ;;  %v2251_v6 = vld [vmem:[#allocation5 + $0xa0] sm:$0xff]  ;;  %v2789_v29 = vld [vmem:[%s4900_s2 + $0x8] ss:$0 sm:$0xff] }
 0x5d5   : > { %v1918_v14 = vadd.f32 %v1917_v62, %v1916_v8  ;;  %v1926_v15 = vadd.f32 %v1925_v12, %v1887_v7  ;;  %v1934_v30 = vadd.f32 %v1933_v11, %v1932_v54  ;;  %v3880_v41 = vpack.c.bf16 %v2144_v39, %v2143_v37  ;;  %v2234_v54 = vld [vmem:[#allocation5 + $0x18] sm:$0xff]  ;;  %v2252_v7 = vld [vmem:[#allocation5 + $0xa8] sm:$0xff]  ;;  %v2235_v62 = vld [vmem:[#allocation5 + $0x20] sm:$0xff] }
 0x5d6   : > { %v3883_v45 = vpack.c.bf16 %v2146_v44, %v2145_v42  ;;  %v3889_v51 = vpack.c.bf16 %v2150_v50, %v2149_v48  ;;  %v3892_v55 = vpack.c.bf16 %v2152_v53, %v2151_v52  ;;  %v3894_v59 = vpack.c.bf16 %v2248_v57, %v2247_v56  ;;  %v2236_v11 = vld [vmem:[#allocation5 + $0x28] sm:$0xff]  ;;  %v2263_v33 = vld [vmem:[#allocation5 + $0x100] sm:$0xff]  ;;  %v2281_v37 = vld [vmem:[#allocation5 + $0x190] sm:$0xff] }
 0x5d7   : > { %v1927_v9 = vrot.slane %v1926_v15, 2  ;;  %v1982_v13 = vsel %vm4919_vm14, %v1918_v14, %v1981_v40  ;;  %v1935_v20 = vrot.slane %v1934_v30, 1  ;;  %v3926_v43 = vpack.c.bf16 %v2280_v60, %v2279_v46  ;;  %v2253_v40 = vld [vmem:[#allocation5 + $0xb0] sm:$0xff]  ;;  %v2254_v14 = vld [vmem:[#allocation5 + $0xb8] sm:$0xff]  ;;  %v2264_v34 = vld [vmem:[#allocation5 + $0x108] sm:$0xff] }
 0x5d8   : > { %v1983_v18 = vsel %vm4920_vm1, %v1924_v16, %v1982_v13  ;;  %v3896_v63 = vpack.c.bf16 %v2232_v61, %v2231_v49  ;;  %3895 = vmatprep.subr.bf16.mxu0 %v3894_v59  ;;  %v3898_v8 = vpack.c.bf16 %v2250_v3, %v2249_v2  ;;  %v3902_v10 = vpack.c.bf16 %v2252_v7, %v2251_v6  ;;  %v2237_v16 = vld [vmem:[#allocation5 + $0x30] sm:$0xff]  ;;  %v2255_v13 = vld [vmem:[#allocation5 + $0xc0] sm:$0xff]  ;;  %v2282_v39 = vld [vmem:[#allocation5 + $0x198] sm:$0xff] }
 0x5d9   : > { %v1928_v19 = vadd.f32 %v1927_v9, %v1926_v15  ;;  %v1936_v24 = vadd.f32 %v1935_v20, %v1934_v30  ;;  %v3904_v12 = vpack.c.bf16 %v2236_v11, %v2235_v62  ;;  %v3906_v15 = vpack.c.bf16 %v2254_v14, %v2253_v40  ;;  %v2238_v30 = vld [vmem:[#allocation5 + $0x38] sm:$0xff]  ;;  %v2239_v20 = vld [vmem:[#allocation5 + $0x40] sm:$0xff]  ;;  %v2284_v48 = vld [vmem:[#allocation5 + $0x1a8] sm:$0xff] }
 0x5da   : > { %3897 = vmatpush3.bf16.msra.mxu0 %v3896_v63  ;;  %v3908_v9 = vpack.c.bf16 %v2238_v30, %v2237_v16  ;;  %v3928_v42 = vpack.c.bf16 %v2264_v34, %v2263_v33  ;;  %v3930_v44 = vpack.c.bf16 %v2282_v39, %v2281_v37  ;;  %v2268_v52 = vld [vmem:[#allocation5 + $0x128] sm:$0xff]  ;;  %v2285_v53 = vld [vmem:[#allocation5 + $0x1b0] sm:$0xff]  ;;  %v2270_v59 = vld [vmem:[#allocation5 + $0x138] sm:$0xff] }
 0x5db   : > { %v1929_v38 = vrot.slane %v1928_v19, 1  ;;  %3899 = vmatprep.subr.bf16.mxu0 %v3898_v8  ;;  %v2269_v46 = vld [vmem:[#allocation5 + $0x130] sm:$0xff]  ;;  %v2287_v60 = vld [vmem:[#allocation5 + $0x1c0] sm:$0xff]  ;;  %v2288_v49 = vld [vmem:[#allocation5 + $0x1c8] sm:$0xff] }
 0x5dc   : > { %v4810_v22 = vpop.f32.mrb[22].mxu0  ;;  %v3940_v61 = vpack.c.bf16 %v2270_v59, %v2269_v46  ;;  %v2271_v63 = vld [vmem:[#allocation5 + $0x140] sm:$0xff]  ;;  %v2272_v2 = vld [vmem:[#allocation5 + $0x148] sm:$0xff]  ;;  %v2289_v3 = vld [vmem:[#allocation5 + $0x1d0] sm:$0xff]  ;;  %v2391_v46 = vsub.s32 7, %v4411_v17 }
 0x5dd   : > { %v1930_v23 = vadd.f32 %v1929_v38, %v1928_v19  ;;  %v3554_v25 = vpop.f32.mrb[23].mxu0  ;;  %v2240_v38 = vld [vmem:[#allocation5 + $0x48] sm:$0xff]  ;;  %v2290_v8 = vld [vmem:[#allocation5 + $0x1d8] sm:$0xff]  ;;  %v2291_v11 = vld [vmem:[#allocation5 + $0x1e0] sm:$0xff] }
 0x5de   : > { %v3912_v5 = vpack.c.bf16 %v2240_v38, %v2239_v20  ;;  %v2274_v6 = vld [vmem:[#allocation5 + $0x158] sm:$0xff]  ;;  %v2260_v62 = vld [vmem:[#allocation5 + $0xe8] sm:$0xff]  ;;  %v2243_v14 = vld [vmem:[#allocation5 + $0x60] sm:$0xff] }
 0x5df   : > { %v1984_v27 = vsel %vm4921_vm3, %v1930_v23, %v1983_v18  ;;  %v2256_v18 = vld [vmem:[#allocation5 + $0xc8] sm:$0xff]  ;;  %v2258_v23 = vld [vmem:[#allocation5 + $0xd8] sm:$0xff]  ;;  %v2293_v38 = vld [vmem:[#allocation5 + $0x1f0] sm:$0xff] }
 0x5e0   : > { %v1985_v31 = vsel %vm4922_vm5, %v1936_v24, %v1984_v27  ;;  %v3910_v19 = vpack.c.bf16 %v2256_v18, %v2255_v13  ;;  %v3914_v25 = vpack.c.bf16 %v2258_v23, %v2257_v21  ;;  %v2241_v24 = vld [vmem:[#allocation5 + $0x50] sm:$0xff]  ;;  %v2292_v40 = vld [vmem:[#allocation5 + $0x1e8] sm:$0xff]  ;;  %v2262_v20 = vld [vmem:[#allocation5 + $0xf8] sm:$0xff] }
 0x5e1   : > { %3518 = vmatmul.mubr.f32.vlgmr.msra.gmra.mrb[8].mxu1 %v1985_v31  ;;  %v3950_v16 = vpack.c.bf16 %v2292_v40, %v2291_v11  ;;  %v2276_v13 = vld [vmem:[#allocation5 + $0x168] sm:$0xff]  ;;  %v2294_v21 = vld [vmem:[#allocation5 + $0x1f8] sm:$0xff]  ;;  %v2245_v23 = vld [vmem:[#allocation5 + $0x70] sm:$0xff] }
 0x5e2   : > { %3872 = vmatpush3.bf16.msra.mxu1 %v3871_v26  ;;  %3587 = vmatprep.mubr.msk.f32.mxu1 %vm4254_vm0, %v4255_v1  ;;  %v2147_v1 = vld [vmem:[#allocation2 + $0x5d0] sm:$0xff]  ;;  %v2242_v26 = vld [vmem:[#allocation5 + $0x58] sm:$0xff]  ;;  %v2343_v33 = vld [vmem:[#allocation5 + $0x380] sm:$0xff] }
 0x5e3   : > { %3873 = vmatprep.subr.bf16.mxu1 %v4253_v0  ;;  %v3886_v58 = vpack.c.bf16 %v2148_v47, %v2147_v1  ;;  %v3916_v27 = vpack.c.bf16 %v2242_v26, %v2241_v24  ;;  %v2266_v1 = vld [vmem:[#allocation5 + $0x118] sm:$0xff]  ;;  %v3954_v24 = vpack.c.bf16 %v2294_v21, %v2293_v38  ;;  %v2790_v39 = vld [vmem:[%s4900_s2 + $0x9] ss:$0 sm:$0xff]  ;;  %v2349_v38 = vld [vmem:[#allocation5 + $0x3b0] sm:$0xff] }
 0x5e4   : > { %v2314_v59 = vld [vmem:[#allocation5 + $0x298] sm:$0xff]  ;;  %v2348_v11 = vld [vmem:[#allocation5 + $0x3a8] sm:$0xff] }
 0x5e6   : > { %3875 = vmatpush3.bf16.msra.mxu1 %v3874_v32 }
 0x5e7   : > { %3876 = vmatprep.subr.bf16.mxu1 %v4253_v0 }
 0x5ea   : > { %3878 = vmatpush3.bf16.msra.mxu1 %v3877_v36 }
 0x5eb   : > { %3879 = vmatprep.subr.bf16.mxu1 %v4253_v0 }
 0x5ee   : > { %3881 = vmatpush3.bf16.msra.mxu1 %v3880_v41 }
 0x5ef   : > { %3882 = vmatprep.subr.bf16.mxu1 %v4253_v0 }
 0x5f2   : > { %3884 = vmatpush3.bf16.msra.mxu1 %v3883_v45  ;;  %v2265_v45 = vld [vmem:[#allocation5 + $0x110] sm:$0xff] }
 0x5f3   : > { %3885 = vmatprep.subr.bf16.mxu1 %v4253_v0  ;;  %v3932_v50 = vpack.c.bf16 %v2266_v1, %v2265_v45  ;;  %v2295_v45 = vld [vmem:[#allocation5 + $0x200] sm:$0xff]  ;;  %v2367_v1 = vsub.s32 1, %v4411_v17 }
 0x5f6   : > { %3887 = vmatpush3.bf16.msra.mxu1 %v3886_v58  ;;  %v2283_v58 = vld [vmem:[#allocation5 + $0x1a0] sm:$0xff] }
 0x5f7   : > { %3888 = vmatprep.subr.bf16.mxu1 %v4253_v0 }
 0x5fa   : > { %3890 = vmatpush3.bf16.msra.mxu1 %v3889_v51  ;;  %v2267_v51 = vld [vmem:[#allocation5 + $0x120] sm:$0xff] }
 0x5fb   : > { %3891 = vmatprep.subr.bf16.mxu1 %v4253_v0  ;;  %v2233_v0 = vld [vmem:[#allocation5 + $0x10] sm:$0xff]  ;;  %v3936_v56 = vpack.c.bf16 %v2268_v52, %v2267_v51  ;;  %v2383_v52 = vsub.s32 5, %v4411_v17 }
 0x5fc   : > { %v3900_v4 = vpack.c.bf16 %v2234_v54, %v2233_v0  ;;  %v3944_v0 = vpack.c.bf16 %v2272_v2, %v2271_v63  ;;  %v3946_v54 = vpack.c.bf16 %v2290_v8, %v2289_v3  ;;  %v2297_v3 = vld [vmem:[#allocation5 + $0x210] sm:$0xff]  ;;  %v2298_v8 = vld [vmem:[#allocation5 + $0x218] sm:$0xff] }
 0x5fd   : > { %v3964_v40 = vpack.c.bf16 %v2298_v8, %v2297_v3  ;;  %v2307_v3 = vld [vmem:[#allocation5 + $0x260] sm:$0xff]  ;;  %v2308_v8 = vld [vmem:[#allocation5 + $0x268] sm:$0xff] }
 0x5fe   : > { %3893 = vmatpush3.bf16.msra.mxu1 %v3892_v55  ;;  %3901 = vmatpush3.bf16.msra.mxu0 %v3900_v4  ;;  %v2286_v55 = vld [vmem:[#allocation5 + $0x1b8] sm:$0xff]  ;;  %v2273_v4 = vld [vmem:[#allocation5 + $0x150] sm:$0xff] }
 0x5ff   : > { %3927 = vmatprep.subr.bf16.mxu1 %v3926_v43  ;;  %3903 = vmatprep.subr.bf16.mxu0 %v3902_v10  ;;  %v3938_v57 = vpack.c.bf16 %v2286_v55, %v2285_v53  ;;  %v3942_v43 = vpack.c.bf16 %v2288_v49, %v2287_v60  ;;  %v3948_v7 = vpack.c.bf16 %v2274_v6, %v2273_v4  ;;  %v2259_v10 = vld [vmem:[#allocation5 + $0xe0] sm:$0xff]  ;;  %v2313_v53 = vld [vmem:[#allocation5 + $0x290] sm:$0xff]  ;;  %v2346_v49 = vld [vmem:[#allocation5 + $0x398] sm:$0xff] }
 0x600   : > { %v2345_v60 = vld [vmem:[#allocation5 + $0x390] sm:$0xff]  ;;  %v2315_v4 = vld [vmem:[#allocation5 + $0x2a0] sm:$0xff]  ;;  %v3962_v6 = vpack.c.bf16 %v2314_v59, %v2313_v53  ;;  %v2306_v53 = vld [vmem:[#allocation5 + $0x258] sm:$0xff] }
 0x601   : > { %v2338_v59 = vld [vmem:[#allocation5 + $0x358] sm:$0xff] }
 0x602   : > { %3905 = vmatpush3.bf16.msra.mxu0 %v3904_v12  ;;  %v3918_v12 = vpack.c.bf16 %v2260_v62, %v2259_v10  ;;  %v2316_v10 = vld [vmem:[#allocation5 + $0x2a8] sm:$0xff]  ;;  %v2347_v62 = vld [vmem:[#allocation5 + $0x3a0] sm:$0xff] }
 0x603   : > { %3907 = vmatprep.subr.bf16.mxu0 %v3906_v15  ;;  %v2244_v15 = vld [vmem:[#allocation5 + $0x68] sm:$0xff] }
 0x604   : > { %v3920_v30 = vpack.c.bf16 %v2244_v15, %v2243_v14  ;;  %v2299_v15 = vld [vmem:[#allocation5 + $0x220] sm:$0xff] }
 0x606   : > { %3909 = vmatpush3.bf16.msra.mxu0 %v3908_v9  ;;  %v2275_v9 = vld [vmem:[#allocation5 + $0x160] sm:$0xff] }
 0x607   : > { %3911 = vmatprep.subr.bf16.mxu0 %v3910_v19  ;;  %v3952_v18 = vpack.c.bf16 %v2276_v13, %v2275_v9  ;;  %v2261_v19 = vld [vmem:[#allocation5 + $0xf0] sm:$0xff]  ;;  %v3998_v9 = vpack.c.bf16 %v2348_v11, %v2347_v62  ;;  %v2331_v13 = vld [vmem:[#allocation5 + $0x320] sm:$0xff]  ;;  %v2358_v11 = vld [vmem:[#allocation5 + $0x3f8] sm:$0xff] }
 0x608   : > { %v2357_v62 = vld [vmem:[#allocation5 + $0x3f0] sm:$0xff] }
 0x60a   : > { %3913 = vmatpush3.bf16.msra.mxu0 %v3912_v5  ;;  %v3922_v5 = vpack.c.bf16 %v2262_v20, %v2261_v19  ;;  %v2317_v19 = vld [vmem:[#allocation5 + $0x2b0] sm:$0xff]  ;;  %v2318_v20 = vld [vmem:[#allocation5 + $0x2b8] sm:$0xff] }
 0x60b   : > { %3915 = vmatprep.subr.bf16.mxu0 %v3914_v25  ;;  %v2246_v25 = vld [vmem:[#allocation5 + $0x78] sm:$0xff] }
 0x60c   : > { %v3924_v26 = vpack.c.bf16 %v2246_v25, %v2245_v23  ;;  %v2301_v25 = vld [vmem:[#allocation5 + $0x230] sm:$0xff] }
 0x60e   : > { %3917 = vmatpush3.bf16.msra.mxu0 %v3916_v27  ;;  %v2277_v27 = vld [vmem:[#allocation5 + $0x170] sm:$0xff] }
 0x60f   : > { %3919 = vmatprep.subr.bf16.mxu0 %v3918_v12 }
 0x612   : > { %3921 = vmatpush3.bf16.msra.mxu0 %v3920_v30  ;;  %v3966_v30 = vpack.c.bf16 %v2316_v10, %v2315_v4  ;;  %v2339_v4 = vld [vmem:[#allocation5 + $0x360] sm:$0xff]  ;;  %v2326_v10 = vld [vmem:[#allocation5 + $0x2f8] sm:$0xff] }
 0x613   : > { %3923 = vmatprep.subr.bf16.mxu0 %v3922_v5  ;;  %v2350_v5 = vld [vmem:[#allocation5 + $0x3b8] sm:$0xff] }
 0x616   : > { %3925 = vmatpush3.bf16.msra.mxu0 %v3924_v26  ;;  %v3970_v26 = vpack.c.bf16 %v2318_v20, %v2317_v19  ;;  %v2379_v19 = vsub.s32 4, %v4411_v17  ;;  %v2387_v20 = vsub.s32 6, %v4411_v17 }
 0x6b4   : > { %v2053_v28 = vpop.f32.mrb[8].mxu1 }
 0x6b5   : > { %v2124_v31 = vadd.f32 %v4810_v22, %v2053_v28  ;;  %v3519_v32 = vpop.f32.mrb[9].mxu1  ;;  %v3934_v22 = vpack.c.bf16 %v2284_v48, %v2283_v58  ;;  %v2278_v28 = vld [vmem:[#allocation5 + $0x178] sm:$0xff]  ;;  %v2371_v58 = vsub.s32 2, %v4411_v17  ;;  %v2296_v48 = vld [vmem:[#allocation5 + $0x208] sm:$0xff] }
 0x6b6   : > { %v2312_v32 = vld [vmem:[#allocation5 + $0x288] sm:$0xff] }
 0x6b7   : > { %v2132_v36 = vadd.f32 %v2789_v29, %v2124_v31  ;;  %v3956_v29 = vpack.c.bf16 %v2278_v28, %v2277_v27  ;;  %v2311_v31 = vld [vmem:[#allocation5 + $0x280] sm:$0xff]  ;;  %v4002_v27 = vpack.c.bf16 %v2350_v5, %v2349_v38  ;;  %v2333_v28 = vld [vmem:[#allocation5 + $0x330] sm:$0xff] }
 0x6b8   : > { %v3958_v34 = vpack.c.bf16 %v2312_v32, %v2311_v31  ;;  %v2319_v31 = vld [vmem:[#allocation5 + $0x2c0] sm:$0xff]  ;;  %v2320_v32 = vld [vmem:[#allocation5 + $0x2c8] sm:$0xff] }
 0x6b9   : > { %v2134_v41 = vmul.f32 0.1, %v2132_v36  ;;  %vm2133_vm0 = vcmp.ge.f32.partialorder %v2132_v36, 0.0 }
 0x6ba   : > { %3959 = vmatprep.subr.bf16.mxu0 %v3958_v34  ;;  %v2352_v34 = vld [vmem:[#allocation5 + $0x3c8] sm:$0xff] }
 0x6bb   : > { %v2135_v47 = vsel %vm2133_vm0, %v2132_v36, %v2134_v41  ;;  %v2344_v36 = vld [vmem:[#allocation5 + $0x388] sm:$0xff] }
 0x6bc   : > { %3588 = vmatmul.mubr.f32.vlgmr.msra.gmra.mrb[10].mxu1 %v2135_v47  ;;  %v3990_v37 = vpack.c.bf16 %v2344_v36, %v2343_v33  ;;  %v2375_v47 = vsub.s32 3, %v4411_v17  ;;  %v2351_v33 = vld [vmem:[#allocation5 + $0x3c0] sm:$0xff] }
 0x6bd   : > { %3929 = vmatpush3.bf16.msra.mxu1 %v3928_v42 }
 0x6be   : > { %3931 = vmatprep.subr.bf16.mxu1 %v3930_v44 }
 0x6c1   : > { %3933 = vmatpush3.bf16.msra.mxu1 %v3932_v50  ;;  %v2327_v50 = vld [vmem:[#allocation5 + $0x300] sm:$0xff] }
 0x6c2   : > { %3935 = vmatprep.subr.bf16.mxu1 %v3934_v22  ;;  %v2328_v22 = vld [vmem:[#allocation5 + $0x308] sm:$0xff] }
 0x6c5   : > { %3937 = vmatpush3.bf16.msra.mxu1 %v3936_v56  ;;  %v3960_v56 = vpack.c.bf16 %v2296_v48, %v2295_v45  ;;  %v2335_v45 = vld [vmem:[#allocation5 + $0x340] sm:$0xff]  ;;  %v2353_v48 = vld [vmem:[#allocation5 + $0x3d0] sm:$0xff] }
 0x6c6   : > { %3939 = vmatprep.subr.bf16.mxu1 %v3938_v57  ;;  %v3992_v57 = vpack.c.bf16 %v2328_v22, %v2327_v50  ;;  %v2354_v50 = vld [vmem:[#allocation5 + $0x3d8] sm:$0xff] }
 0x6c9   : > { %3941 = vmatpush3.bf16.msra.mxu1 %v3940_v61 }
 0x6ca   : > { %3943 = vmatprep.subr.bf16.mxu1 %v3942_v43 }
 0x6cd   : > { %3945 = vmatpush3.bf16.msra.mxu1 %v3944_v0  ;;  %v2329_v0 = vld [vmem:[#allocation5 + $0x310] sm:$0xff] }
 0x6ce   : > { %3947 = vmatprep.subr.bf16.mxu1 %v3946_v54  ;;  %v2330_v54 = vld [vmem:[#allocation5 + $0x318] sm:$0xff] }
 0x6cf   : > { %v3996_v14 = vpack.c.bf16 %v2330_v54, %v2329_v0 }
 0x6d1   : > { %3949 = vmatpush3.bf16.msra.mxu1 %v3948_v7  ;;  %v3994_v7 = vpack.c.bf16 %v2346_v49, %v2345_v60  ;;  %v2323_v60 = vld [vmem:[#allocation5 + $0x2e0] sm:$0xff]  ;;  %v2324_v49 = vld [vmem:[#allocation5 + $0x2e8] sm:$0xff] }
 0x6d2   : > { %3951 = vmatprep.subr.bf16.mxu1 %v3950_v16  ;;  %v2300_v16 = vld [vmem:[#allocation5 + $0x228] sm:$0xff]  ;;  %v3982_v0 = vpack.c.bf16 %v2324_v49, %v2323_v60 }
 0x6d3   : > { %v3968_v21 = vpack.c.bf16 %v2300_v16, %v2299_v15  ;;  %v4018_v15 = vpack.c.bf16 %v2358_v11, %v2357_v62  ;;  %v2310_v16 = vld [vmem:[#allocation5 + $0x278] sm:$0xff] }
 0x6d5   : > { %3953 = vmatpush3.bf16.msra.mxu1 %v3952_v18  ;;  %v2332_v18 = vld [vmem:[#allocation5 + $0x328] sm:$0xff] }
 0x6d6   : > { %3955 = vmatprep.subr.bf16.mxu1 %v3954_v24  ;;  %v4000_v23 = vpack.c.bf16 %v2332_v18, %v2331_v13  ;;  %v2302_v24 = vld [vmem:[#allocation5 + $0x238] sm:$0xff] }
 0x6d7   : > { %v3972_v36 = vpack.c.bf16 %v2302_v24, %v2301_v25  ;;  %v2359_v25 = vld [vmem:[%s4900_s2 + $0xa] sm:$0x1] }
 0x6d9   : > { %3957 = vmatpush3.bf16.msra.mxu1 %v3956_v29  ;;  %v2334_v29 = vld [vmem:[#allocation5 + $0x338] sm:$0xff] }
 0x6da   : > { %3991 = vmatprep.subr.bf16.mxu1 %v3990_v37  ;;  %v4004_v37 = vpack.c.bf16 %v2334_v29, %v2333_v28 }
 0x78f   : > { %v2224_v41 = vpop.f32.mrb[10].mxu1 }
 0x790   : > { %v2225_v42 = vadd.f32 %v2790_v39, %v2224_v41  ;;  %v3589_v44 = vpop.f32.mrb[11].mxu1  ;;  %v2303_v39 = vld [vmem:[#allocation5 + $0x240] sm:$0xff]  ;;  %v2304_v41 = vld [vmem:[#allocation5 + $0x248] sm:$0xff] }
 0x791   : > { %v4006_v44 = vpack.c.bf16 %v2352_v34, %v2351_v33  ;;  %v3976_v22 = vpack.c.bf16 %v2304_v41, %v2303_v39 }
 0x792   : > { %vm2228_vm4 = vcmp.ge.f32.partialorder %v2225_v42, 0.0  ;;  %v2229_v51 = vmul.f32 0.1, %v2225_v42 }
 0x794   : > { %v4834_v55 = vsel %vm2228_vm4, %v2225_v42, %v2229_v51  ;;  %v3974_v42 = vpack.c.bf16 %v2320_v32, %v2319_v31 }
 0x795   : > { %v2368_v61 = vrot.slane %v4834_v55, %v2367_v1  ;;  %v2376_v43 = vrot.slane %v4834_v55, %v2375_v47  ;;  %v2364_v63 = vrot.slane %v4834_v55, %v4428_v35  ;;  %v2372_v2 = vrot.slane %v4834_v55, %v2371_v58  ;;  %v2336_v1 = vld [vmem:[#allocation5 + $0x348] sm:$0xff]  ;;  %v2321_v47 = vld [vmem:[#allocation5 + $0x2d0] sm:$0xff]  ;;  %v2322_v58 = vld [vmem:[#allocation5 + $0x2d8] sm:$0xff] }
 0x796   : > { %v2384_v12 = vrot.slane %v4834_v55, %v2383_v52  ;;  %v2392_v35 = vrot.slane %v4834_v55, %v2391_v46  ;;  %v4008_v51 = vpack.c.bf16 %v2336_v1, %v2335_v45  ;;  %v2305_v52 = vld [vmem:[#allocation5 + $0x250] sm:$0xff]  ;;  %v2380_v38 = vrot.slane %v4834_v55, %v2379_v19 }
 0x797   : > { %2465 = vmatprep.mubr.f32.mxu0 %v2368_v61  ;;  %2535 = vmatprep.mubr.f32.mxu1 %v2376_v43  ;;  %v2337_v46 = vld [vmem:[#allocation5 + $0x350] sm:$0xff]  ;;  %v2355_v61 = vld [vmem:[#allocation5 + $0x3e0] sm:$0xff]  ;;  %v2356_v43 = vld [vmem:[#allocation5 + $0x3e8] sm:$0xff]  ;;  %v2388_v5 = vrot.slane %v4834_v55, %v2387_v20 }
 0x798   : > { %2466 = vmatmul.mubr.f32.vlgmr.msra.gmra.mrb[24].mxu0 %v2364_v63  ;;  %2536 = vmatmul.mubr.f32.vlgmr.msra.gmra.mrb[12].mxu1 %v2372_v2  ;;  %v3980_v63 = vpack.c.bf16 %v2306_v53, %v2305_v52  ;;  %v4012_v2 = vpack.c.bf16 %v2338_v59, %v2337_v46  ;;  %v4014_v54 = vpack.c.bf16 %v2356_v43, %v2355_v61 }
 0x799   : > { %3961 = vmatpush3.bf16.msra.mxu0 %v3960_v56  ;;  %3993 = vmatpush3.bf16.msra.mxu1 %v3992_v57  ;;  %v3978_v56 = vpack.c.bf16 %v2322_v58, %v2321_v47  ;;  %v4010_v57 = vpack.c.bf16 %v2354_v50, %v2353_v48 }
 0x79a   : > { %2605 = vmatprep.mubr.f32.mxu0 %v2384_v12  ;;  %2675 = vmatprep.mubr.f32.mxu1 %v2392_v35  ;;  %v3984_v12 = vpack.c.bf16 %v2308_v8, %v2307_v3 }
 0x79b   : > { %3963 = vmatprep.subr.bf16.mxu0 %v3962_v6  ;;  %3995 = vmatprep.subr.bf16.mxu1 %v3994_v7  ;;  %v2340_v6 = vld [vmem:[#allocation5 + $0x368] sm:$0xff]  ;;  %v2325_v7 = vld [vmem:[#allocation5 + $0x2f0] sm:$0xff] }
 0x79c   : > { %v4016_v35 = vpack.c.bf16 %v2340_v6, %v2339_v4 }
 0x79d   : > { %3965 = vmatpush3.bf16.msra.mxu0 %v3964_v40  ;;  %3997 = vmatpush3.bf16.msra.mxu1 %v3996_v14  ;;  %v2309_v40 = vld [vmem:[#allocation5 + $0x270] sm:$0xff]  ;;  %v3986_v14 = vpack.c.bf16 %v2326_v10, %v2325_v7 }
 0x79e   : > { %3967 = vmatprep.subr.bf16.mxu0 %v3966_v30  ;;  %3999 = vmatprep.subr.bf16.mxu1 %v3998_v9  ;;  %v2341_v30 = vld [vmem:[#allocation5 + $0x370] sm:$0xff]  ;;  %v2342_v9 = vld [vmem:[#allocation5 + $0x378] sm:$0xff]  ;;  %v3988_v13 = vpack.c.bf16 %v2310_v16, %v2309_v40 }
 0x79f   : > { %v4020_v18 = vpack.c.bf16 %v2342_v9, %v2341_v30 }
 0x7a1   : > { %3969 = vmatpush3.bf16.msra.mxu0 %v3968_v21  ;;  %4001 = vmatpush3.bf16.msra.mxu1 %v4000_v23 }
 0x7a2   : > { %3971 = vmatprep.subr.bf16.mxu0 %v3970_v26  ;;  %4003 = vmatprep.subr.bf16.mxu1 %v4002_v27 }
 0x7a5   : > { %3973 = vmatpush3.bf16.msra.mxu0 %v3972_v36  ;;  %4005 = vmatpush3.bf16.msra.mxu1 %v4004_v37 }
 0x7a6   : > { %3975 = vmatprep.subr.bf16.mxu0 %v3974_v42  ;;  %4007 = vmatprep.subr.bf16.mxu1 %v4006_v44 }
 0x7a9   : > { %3977 = vmatpush3.bf16.msra.mxu0 %v3976_v22  ;;  %4009 = vmatpush3.bf16.msra.mxu1 %v4008_v51 }
 0x7aa   : > { %3979 = vmatprep.subr.bf16.mxu0 %v3978_v56  ;;  %4011 = vmatprep.subr.bf16.mxu1 %v4010_v57 }
 0x7ad   : > { %3981 = vmatpush3.bf16.msra.mxu0 %v3980_v63  ;;  %4013 = vmatpush3.bf16.msra.mxu1 %v4012_v2 }
 0x7ae   : > { %3983 = vmatprep.subr.bf16.mxu0 %v3982_v0  ;;  %4015 = vmatprep.subr.bf16.mxu1 %v4014_v54 }
 0x7b1   : > { %3985 = vmatpush3.bf16.msra.mxu0 %v3984_v12  ;;  %4017 = vmatpush3.bf16.msra.mxu1 %v4016_v35 }
 0x7b2   : > { %3987 = vmatprep.subr.bf16.mxu0 %v3986_v14  ;;  %4019 = vmatprep.subr.bf16.mxu1 %v4018_v15 }
 0x7b5   : > { %3989 = vmatpush3.bf16.msra.mxu0 %v3988_v13  ;;  %4021 = vmatpush3.bf16.msra.mxu1 %v4020_v18 }
 0x7b8   : > { %2606 = vmatmul.mubr.f32.vlgmr.msra.gmra.mrb[26].mxu0 %v2380_v38  ;;  %2676 = vmatmul.mubr.f32.vlgmr.msra.gmra.mrb[14].mxu1 %v2388_v5 }
 0x86b   : > { %v3044_v21 = vpop.f32.mrb[24].mxu0  ;;  %v3079_v23 = vpop.f32.mrb[12].mxu1 }
 0x86c   : > { %v3045_v24 = vpop.f32.mrb[25].mxu0  ;;  %v3080_v26 = vpop.f32.mrb[13].mxu1 }
 0x86d   : > { %v3046_v27 = vadd.f32 %v3045_v24, %v3044_v21  ;;  %v3081_v17 = vadd.f32 %v3080_v26, %v3079_v23 }
 0x86f   : > { %v2468_v28 = vadd.f32 %v3046_v27, %v2359_v25 }
 0x871   : > { %v2538_v29 = vadd.f32 %v3081_v17, %v2468_v28 }
 0x88b   : > { %v3114_v31 = vpop.f32.mrb[26].mxu0  ;;  %v3149_v32 = vpop.f32.mrb[14].mxu1 }
 0x88c   : > { %v3115_v55 = vpop.f32.mrb[27].mxu0  ;;  %v3150_v33 = vpop.f32.mrb[15].mxu1 }
 0x88d   : > { %v3116_v34 = vadd.f32 %v3115_v55, %v3114_v31  ;;  %v3151_v36 = vadd.f32 %v3150_v33, %v3149_v32 }
 0x88f   : > { %v2608_v37 = vadd.f32 %v3116_v34, %v2538_v29 }
 0x891   : > { %v2678_v39 = vadd.f32 %v3151_v36, %v2608_v37 }
 0x893   : > { %2681 = vst [vmem:[%s217_s11] sm:$0x1] %v2678_v39 }
 0x894   : > { %4190 = shalt.err (!%p4187_p11)
}
 0x895   : > { %s4191_s22 = scalar_lea.hbm %s4856_s14, 16  ;;  %s4195_s5 = scalar_lea.hbm %s4902_s4, 32 }
 0x896   : > { %p4192_p13 = scmp.ne.s32.totalorder %s4856_s14, %s4191_s22  ;;  %p4196_p6 = scmp.lt.u32.totalorder %s4856_s14, %s4902_s4 }
 0x897   : > { %p4197_p9 = scmp.lt.u32.totalorder %s4195_s5, %s4191_s22  ;;  %p4199_p10 = scmp.lt.u32.totalorder %s4191_s22, %s4856_s14 }
 0x898   : > { %p4193_p5 = pnand %p4192_p13, %p4923_p1 }
 0x899   : > { %p4198_p12 = por %p4197_p9, %p4196_p6 }
 0x89a   : > { %p4194_p0 = pneg %p4193_p5 }
 0x89b   : > { %p4200_p2 = por %p4199_p10, %p4198_p12 }
 0x89d   : > { %p4201_p3 = pnand %p4200_p2, %p4194_p0 }
 0x89f   : > { %4204 = shalt.err (!%p4201_p3)
}
 0x8a0   : > { %4030 = dma.vmem_to_hbm [thread:$0]  (%p4923_p1), %s4858_s12, 16, %s4856_s14, %s2683_s27  }
 0x8a1 PF: > { %p4047_p4 = scmp.ge.s32.totalorder %s4247_s18, 2  ;;  %s2707_s9 = sand.u32 1, %s4235_s15  }
 0x8a2   : > { %p4924_p7 = scmp.ne.s32.totalorder %s4911_s26, 0  ;;  %s2708_s10 = scalar_lea.sflag [#allocation4], %s2707_s9 }
 0x8a4   : > { %p4040_p8 = pnand %p4047_p4, %p4924_p7 }
 0x8a6   : > { %4230 = dma.done.wait (!%p4040_p8), %s2708_s10, 16  }
 0x8a7   : > { %4232 = vsyncadd (!%p4040_p8), %s2708_s10, 4294967280  ;;  %p16_p11 = scmp.ge.s32.totalorder %s4308_s21, 4   ;;  %s4925_s15 = smov %s4239_s16 }
 0x8a8   : > { %s4926_s16 = smov %s4243_s17  ;;  %s4927_s17 = smov %s4319_s24 }
 0x8a9   : > { %s4928_s18 = smov %s4308_s21  ;;  %18 = sbr.rel (!%p16_p11) target bundleno = 5 (0x5), region = 91 }
 0x8b0   :  { %2712 = vsyncpa [#allocation3], 1 }
 0x8b1   :  { %2714 = vsyncpa [#allocation3 + $0x1], 1 }
 0x8b2   :  { %2715 = vsyncpa [#allocation6], 1 }
 0x8b3   :  { %2716 = vsyncpa [#allocation4], 1 }
 0x8b4   :  { %2718 = vsyncpa [#allocation4 + $0x1], 1 }

</bundles_post_ra>
